<compile_context>
chip_gen: v7x
topology: tpu7x:2x2x1
jax: 0.10.0
libtpu: 0.0.40
codegen_flags: <defaults>
</compile_context>

<pallas_src>
import jax
import jax.numpy as jnp
from jax.experimental import pallas as pl
from jax.experimental.pallas import tpu as pltpu


def _gelu(v):
    # Exact (erf-based) GELU matching torch.nn.GELU() default.
    # erf via Abramowitz-Stegun 7.1.26 (|abs err| <= 1.5e-7); the reciprocal
    # runs on the EUP (approx) + one Newton step (VALU) -> ~f32-exact 1/d.
    x = v * 0.7071067811865475
    a = jnp.abs(x)
    d = 1.0 + 0.3275911 * a
    r = pl.reciprocal(d, approx=True)
    t = r * (2.0 - d * r)                       # Newton refine: err ~ e^2
    poly = t * (0.254829592 + t * (-0.284496736 + t * (1.421413741 +
           t * (-1.453152027 + t * 1.061405429))))
    erf_a = 1.0 - poly * jnp.exp(-a * a)
    erf_x = jnp.where(x >= 0.0, erf_a, -erf_a)
    return 0.5 * v * (1.0 + erf_x)


def _make_kernel(H, W):
    # Tap k = ki*3 + kj reads the input at spatial offset (ki-1, kj-1); in the
    # flattened (C, H*W) layout that is a static lane shift of (ki-1)*W + (kj-1).
    shifts = tuple((ki - 1) * W + (kj - 1) for ki in range(3) for kj in range(3))

    def kernel(x_ref, masks_ref,
               w1_ref, b1_ref, g1_ref, be1_ref,
               w2_ref, b2_ref, g2_ref, be2_ref,
               o_ref):
        masks = masks_ref[...]                              # (9, HW)

        def conv_stage(v, w_ref, b, g, be):
            # v: (C_in, HW); w_ref: (9, C_out, C_in) fused depthwise*pointwise.
            # Center tap (k=4): no roll, no mask.  All MACs go to the MXU.
            acc = jnp.dot(w_ref[4], v, preferred_element_type=jnp.float32)
            for k, s in enumerate(shifts):
                if k == 4:
                    continue
                tap = jnp.roll(v, -s, axis=1) * masks[k:k + 1, :]   # XLU + 1 VALU mul
                acc = acc + jnp.dot(w_ref[k], tap,
                                    preferred_element_type=jnp.float32)
            y = acc + b
            # GroupNorm with num_groups == num_channels: per-channel spatial stats.
            mu = jnp.mean(y, axis=1, keepdims=True)
            yc = y - mu
            var = jnp.mean(yc * yc, axis=1, keepdims=True)
            y = yc * jax.lax.rsqrt(var + 1e-5) * g + be
            return _gelu(y)

        y = conv_stage(x_ref[0], w1_ref, b1_ref[...], g1_ref[...], be1_ref[...])
        y = conv_stage(y, w2_ref, b2_ref[...], g2_ref[...], be2_ref[...])
        o_ref[0] = y

    return kernel


def _pad_rows(a, rows):
    pad = rows - a.shape[0]
    return a if pad == 0 else jnp.pad(a, ((0, pad),) + ((0, 0),) * (a.ndim - 1))


def double_conv(x_nchw, params):
    """Pallas implementation of DoubleConv.forward (NCHW in / NCHW out)."""
    B, c_in, H, W = x_nchw.shape
    c_mid = params["w_pw1"].shape[0]
    c_out = params["w_pw2"].shape[0]
    HW = H * W
    f32 = jnp.float32

    # Pad channel counts up to the f32 sublane multiple (8) -> full vreg tiles.
    c_mid_p = -(-c_mid // 8) * 8
    c_out_p = -(-c_out // 8) * 8

    # NCHW -> (B, C, H*W) is a pure reshape (no transpose / extra HBM pass).
    x = x_nchw.astype(f32).reshape(B, c_in, HW)

    # Border-validity masks for the 9 depthwise taps (shared by both stages).
    idx = jnp.arange(HW, dtype=jnp.int32)
    row, col = idx // W, idx % W
    masks = jnp.stack(
        [(((row + (ki - 1)) >= 0) & ((row + (ki - 1)) < H) &
          ((col + (kj - 1)) >= 0) & ((col + (kj - 1)) < W)).astype(f32)
         for ki in range(3) for kj in range(3)])            # (9, HW)

    # Fold depthwise into pointwise: w_full[k, o, c] = pw[o, c] * dw[c, k];
    # fold the depthwise bias into the pointwise bias (1x1 conv is linear).
    dw1 = params["w_dw1"].astype(f32).reshape(c_in, 9)                # (c, k)
    pw1 = params["w_pw1"][:, :, 0, 0].astype(f32)                     # (o, c)
    w1 = jnp.einsum("oc,ck->koc", pw1, dw1)                           # (9, c_mid, c_in)
    b1 = (pw1 @ params["b_dw1"].astype(f32)
          + params["b_pw1"].astype(f32)).reshape(c_mid, 1)
    g1 = params["g1"].astype(f32).reshape(c_mid, 1)
    be1 = params["be1"].astype(f32).reshape(c_mid, 1)

    dw2 = params["w_dw2"].astype(f32).reshape(c_mid, 9)
    pw2 = params["w_pw2"][:, :, 0, 0].astype(f32)                     # (o, c)
    w2 = jnp.einsum("oc,ck->koc", pw2, dw2)                           # (9, c_out, c_mid)
    b2 = (pw2 @ params["b_dw2"].astype(f32)
          + params["b_pw2"].astype(f32)).reshape(c_out, 1)
    g2 = params["g2"].astype(f32).reshape(c_out, 1)
    be2 = params["be2"].astype(f32).reshape(c_out, 1)

    # Zero-pad channel dims (padded rows stay exactly 0 through GN+GELU).
    if c_mid_p != c_mid:
        w1 = jnp.pad(w1, ((0, 0), (0, c_mid_p - c_mid), (0, 0)))
        b1, g1, be1 = (_pad_rows(a, c_mid_p) for a in (b1, g1, be1))
        w2 = jnp.pad(w2, ((0, 0), (0, 0), (0, c_mid_p - c_mid)))
    if c_out_p != c_out:
        w2 = jnp.pad(w2, ((0, 0), (0, c_out_p - c_out), (0, 0)))
        b2, g2, be2 = (_pad_rows(a, c_out_p) for a in (b2, g2, be2))

    consts = (masks, w1, b1, g1, be1, w2, b2, g2, be2)

    def full_spec(a):
        return pl.BlockSpec(a.shape, lambda b, _n=a.ndim: (0,) * _n)

    out = pl.pallas_call(
        _make_kernel(H, W),
        out_shape=jax.ShapeDtypeStruct((B, c_out_p, HW), f32),
        grid_spec=pltpu.PrefetchScalarGridSpec(
            num_scalar_prefetch=0,
            grid=(B,),
            in_specs=[pl.BlockSpec((1, c_in, HW), lambda b: (b, 0, 0))]
                     + [full_spec(a) for a in consts],
            out_specs=pl.BlockSpec((1, c_out_p, HW), lambda b: (b, 0, 0))),
        compiler_params=pltpu.CompilerParams(
            dimension_semantics=("parallel",)),
    )(x, *consts)

    return out[:, :c_out, :].reshape(B, c_out, H, W)


def reference_forward(x, p):
    """Pure-JAX (NCHW) replica of the PyTorch forward, for validation."""
    def dwconv(x, w, b):
        c = x.shape[1]
        y = jax.lax.conv_general_dilated(
            x, w, window_strides=(1, 1), padding=((1, 1), (1, 1)),
            dimension_numbers=("NCHW", "OIHW", "NCHW"), feature_group_count=c)
        return y + b[None, :, None, None]

    def pwconv(x, w, b):
        y = jax.lax.conv_general_dilated(
            x, w, window_strides=(1, 1), padding=((0, 0), (0, 0)),
            dimension_numbers=("NCHW", "OIHW", "NCHW"))
        return y + b[None, :, None, None]

    def gn(x, g, be, eps=1e-5):
        mu = jnp.mean(x, axis=(2, 3), keepdims=True)
        var = jnp.mean((x - mu) ** 2, axis=(2, 3), keepdims=True)
        return (x - mu) * jax.lax.rsqrt(var + eps) * g[None, :, None, None] \
            + be[None, :, None, None]

    act = lambda v: jax.nn.gelu(v, approximate=False)   # exact erf GELU
    y = dwconv(x, p["w_dw1"], p["b_dw1"])
    y = pwconv(y, p["w_pw1"], p["b_pw1"])
    y = act(gn(y, p["g1"], p["be1"]))
    y = dwconv(y, p["w_dw2"], p["b_dw2"])
    y = pwconv(y, p["w_pw2"], p["b_pw2"])
    y = act(gn(y, p["g2"], p["be2"]))
    return y


if __name__ == "__main__":
    key = jax.random.PRNGKey(0)
    B, c_in, H, W = 2, 4, 16, 16
    c_out = 6
    c_mid = 2 * c_in

    ks = jax.random.split(key, 13)
    params = {
        "w_dw1": 0.3 * jax.random.normal(ks[0], (c_in, 1, 3, 3), jnp.float32),
        "b_dw1": 0.1 * jax.random.normal(ks[1], (c_in,), jnp.float32),
        "w_pw1": 0.3 * jax.random.normal(ks[2], (c_mid, c_in, 1, 1), jnp.float32),
        "b_pw1": 0.1 * jax.random.normal(ks[3], (c_mid,), jnp.float32),
        "g1": 1.0 + 0.1 * jax.random.normal(ks[4], (c_mid,), jnp.float32),
        "be1": 0.1 * jax.random.normal(ks[5], (c_mid,), jnp.float32),
        "w_dw2": 0.3 * jax.random.normal(ks[6], (c_mid, 1, 3, 3), jnp.float32),
        "b_dw2": 0.1 * jax.random.normal(ks[7], (c_mid,), jnp.float32),
        "w_pw2": 0.3 * jax.random.normal(ks[8], (c_out, c_mid, 1, 1), jnp.float32),
        "b_pw2": 0.1 * jax.random.normal(ks[9], (c_out,), jnp.float32),
        "g2": 1.0 + 0.1 * jax.random.normal(ks[10], (c_out,), jnp.float32),
        "be2": 0.1 * jax.random.normal(ks[11], (c_out,), jnp.float32),
    }
    x = jax.random.normal(ks[12], (B, c_in, H, W), jnp.float32)

    out = jax.block_until_ready(double_conv(x, params))
    ref = jax.block_until_ready(reference_forward(x, params))

    assert out.shape == (B, c_out, H, W), out.shape
    err = float(jnp.max(jnp.abs(out - ref)))
    if err < 1e-3:
        print("KERNEL_OK")
    else:
        raise SystemExit(f"mismatch: max abs err = {err}")
</pallas_src>

<mosaic_0001>
module attributes {stable_mosaic.version = 11 : i64} {
  func.func @kernel(%arg0: i32, %arg1: memref<1x4x256xf32, #tpu.memory_space<vmem>>, %arg2: memref<9x256xf32, #tpu.memory_space<vmem>>, %arg3: memref<9x8x4xf32, #tpu.memory_space<vmem>>, %arg4: memref<8x1xf32, #tpu.memory_space<vmem>>, %arg5: memref<8x1xf32, #tpu.memory_space<vmem>>, %arg6: memref<8x1xf32, #tpu.memory_space<vmem>>, %arg7: memref<9x8x8xf32, #tpu.memory_space<vmem>>, %arg8: memref<8x1xf32, #tpu.memory_space<vmem>>, %arg9: memref<8x1xf32, #tpu.memory_space<vmem>>, %arg10: memref<8x1xf32, #tpu.memory_space<vmem>>, %arg11: memref<1x8x256xf32, #tpu.memory_space<vmem>>) attributes {dimension_semantics = [#tpu.dimension_semantics<parallel>], iteration_bounds = array<i64: 2>, scalar_prefetch = 0 : i64, scratch_operands = 0 : i64, tpu.core_type = #tpu.core_type<tc>, window_params = [{transform_indices = @transform_0, window_bounds = array<i64: 1, 4, 256>}, {pipeline_mode = #tpu.pipeline_mode<synchronous>, transform_indices = @transform_1, window_bounds = array<i64: 9, 256>}, {pipeline_mode = #tpu.pipeline_mode<synchronous>, transform_indices = @transform_2, window_bounds = array<i64: 9, 8, 4>}, {pipeline_mode = #tpu.pipeline_mode<synchronous>, transform_indices = @transform_3, window_bounds = array<i64: 8, 1>}, {pipeline_mode = #tpu.pipeline_mode<synchronous>, transform_indices = @transform_4, window_bounds = array<i64: 8, 1>}, {pipeline_mode = #tpu.pipeline_mode<synchronous>, transform_indices = @transform_5, window_bounds = array<i64: 8, 1>}, {pipeline_mode = #tpu.pipeline_mode<synchronous>, transform_indices = @transform_6, window_bounds = array<i64: 9, 8, 8>}, {pipeline_mode = #tpu.pipeline_mode<synchronous>, transform_indices = @transform_7, window_bounds = array<i64: 8, 1>}, {pipeline_mode = #tpu.pipeline_mode<synchronous>, transform_indices = @transform_8, window_bounds = array<i64: 8, 1>}, {pipeline_mode = #tpu.pipeline_mode<synchronous>, transform_indices = @transform_9, window_bounds = array<i64: 8, 1>}, {transform_indices = @transform_10, window_bounds = array<i64: 1, 8, 256>}]} {
    %c0 = arith.constant 0 : index
    %c0_0 = arith.constant 0 : index
    %0 = vector.load %arg2[%c0, %c0_0] : memref<9x256xf32, #tpu.memory_space<vmem>>, vector<9x256xf32>
    %c0_1 = arith.constant 0 : index
    %c0_2 = arith.constant 0 : index
    %c0_3 = arith.constant 0 : index
    %1 = vector.load %arg1[%c0_1, %c0_2, %c0_3] : memref<1x4x256xf32, #tpu.memory_space<vmem>>, vector<1x4x256xf32>
    %2 = vector.shape_cast %1 : vector<1x4x256xf32> to vector<4x256xf32>
    %c0_4 = arith.constant 0 : index
    %c0_5 = arith.constant 0 : index
    %3 = vector.load %arg4[%c0_4, %c0_5] : memref<8x1xf32, #tpu.memory_space<vmem>>, vector<8x1xf32>
    %c0_6 = arith.constant 0 : index
    %c0_7 = arith.constant 0 : index
    %4 = vector.load %arg5[%c0_6, %c0_7] : memref<8x1xf32, #tpu.memory_space<vmem>>, vector<8x1xf32>
    %c0_8 = arith.constant 0 : index
    %c0_9 = arith.constant 0 : index
    %5 = vector.load %arg6[%c0_8, %c0_9] : memref<8x1xf32, #tpu.memory_space<vmem>>, vector<8x1xf32>
    %c4 = arith.constant 4 : index
    %c0_10 = arith.constant 0 : index
    %c0_11 = arith.constant 0 : index
    %6 = vector.load %arg3[%c4, %c0_10, %c0_11] : memref<9x8x4xf32, #tpu.memory_space<vmem>>, vector<1x8x4xf32>
    %7 = vector.shape_cast %6 : vector<1x8x4xf32> to vector<8x4xf32>
    %cst = arith.constant dense<0.000000e+00> : vector<8x256xf32>
    %8 = tpu.matmul %7, %2, %cst {dimension_numbers = #tpu.dot_dimension_numbers<[1], [0], [0], [1], [0, 0, 1, 1], [], []>} : vector<8x4xf32>, vector<4x256xf32>, vector<8x256xf32> -> vector<8x256xf32>
    %9 = vector.extract_strided_slice %2 {offsets = [0, 239], sizes = [4, 17], strides = [1, 1]} : vector<4x256xf32> to vector<4x17xf32>
    %10 = vector.extract_strided_slice %2 {offsets = [0, 0], sizes = [4, 239], strides = [1, 1]} : vector<4x256xf32> to vector<4x239xf32>
    %11 = tpu.concatenate %9, %10 in 1 : vector<4x17xf32>, vector<4x239xf32> -> vector<4x256xf32>
    %12 = vector.extract_strided_slice %0 {offsets = [0, 0], sizes = [1, 256], strides = [1, 1]} : vector<9x256xf32> to vector<1x256xf32>
    %13 = vector.broadcast %12 : vector<1x256xf32> to vector<4x256xf32>
    %14 = arith.mulf %11, %13 : vector<4x256xf32>
    %c0_12 = arith.constant 0 : index
    %c0_13 = arith.constant 0 : index
    %c0_14 = arith.constant 0 : index
    %15 = vector.load %arg3[%c0_12, %c0_13, %c0_14] : memref<9x8x4xf32, #tpu.memory_space<vmem>>, vector<1x8x4xf32>
    %16 = vector.shape_cast %15 : vector<1x8x4xf32> to vector<8x4xf32>
    %cst_15 = arith.constant dense<0.000000e+00> : vector<8x256xf32>
    %17 = tpu.matmul %16, %14, %cst_15 {dimension_numbers = #tpu.dot_dimension_numbers<[1], [0], [0], [1], [0, 0, 1, 1], [], []>} : vector<8x4xf32>, vector<4x256xf32>, vector<8x256xf32> -> vector<8x256xf32>
    %18 = arith.addf %8, %17 : vector<8x256xf32>
    %19 = vector.extract_strided_slice %2 {offsets = [0, 240], sizes = [4, 16], strides = [1, 1]} : vector<4x256xf32> to vector<4x16xf32>
    %20 = vector.extract_strided_slice %2 {offsets = [0, 0], sizes = [4, 240], strides = [1, 1]} : vector<4x256xf32> to vector<4x240xf32>
    %21 = tpu.concatenate %19, %20 in 1 : vector<4x16xf32>, vector<4x240xf32> -> vector<4x256xf32>
    %22 = vector.extract_strided_slice %0 {offsets = [1, 0], sizes = [1, 256], strides = [1, 1]} : vector<9x256xf32> to vector<1x256xf32>
    %23 = vector.broadcast %22 : vector<1x256xf32> to vector<4x256xf32>
    %24 = arith.mulf %21, %23 : vector<4x256xf32>
    %c1 = arith.constant 1 : index
    %c0_16 = arith.constant 0 : index
    %c0_17 = arith.constant 0 : index
    %25 = vector.load %arg3[%c1, %c0_16, %c0_17] : memref<9x8x4xf32, #tpu.memory_space<vmem>>, vector<1x8x4xf32>
    %26 = vector.shape_cast %25 : vector<1x8x4xf32> to vector<8x4xf32>
    %cst_18 = arith.constant dense<0.000000e+00> : vector<8x256xf32>
    %27 = tpu.matmul %26, %24, %cst_18 {dimension_numbers = #tpu.dot_dimension_numbers<[1], [0], [0], [1], [0, 0, 1, 1], [], []>} : vector<8x4xf32>, vector<4x256xf32>, vector<8x256xf32> -> vector<8x256xf32>
    %28 = arith.addf %18, %27 : vector<8x256xf32>
    %29 = vector.extract_strided_slice %2 {offsets = [0, 241], sizes = [4, 15], strides = [1, 1]} : vector<4x256xf32> to vector<4x15xf32>
    %30 = vector.extract_strided_slice %2 {offsets = [0, 0], sizes = [4, 241], strides = [1, 1]} : vector<4x256xf32> to vector<4x241xf32>
    %31 = tpu.concatenate %29, %30 in 1 : vector<4x15xf32>, vector<4x241xf32> -> vector<4x256xf32>
    %32 = vector.extract_strided_slice %0 {offsets = [2, 0], sizes = [1, 256], strides = [1, 1]} : vector<9x256xf32> to vector<1x256xf32>
    %33 = vector.broadcast %32 : vector<1x256xf32> to vector<4x256xf32>
    %34 = arith.mulf %31, %33 : vector<4x256xf32>
    %c2 = arith.constant 2 : index
    %c0_19 = arith.constant 0 : index
    %c0_20 = arith.constant 0 : index
    %35 = vector.load %arg3[%c2, %c0_19, %c0_20] : memref<9x8x4xf32, #tpu.memory_space<vmem>>, vector<1x8x4xf32>
    %36 = vector.shape_cast %35 : vector<1x8x4xf32> to vector<8x4xf32>
    %cst_21 = arith.constant dense<0.000000e+00> : vector<8x256xf32>
    %37 = tpu.matmul %36, %34, %cst_21 {dimension_numbers = #tpu.dot_dimension_numbers<[1], [0], [0], [1], [0, 0, 1, 1], [], []>} : vector<8x4xf32>, vector<4x256xf32>, vector<8x256xf32> -> vector<8x256xf32>
    %38 = arith.addf %28, %37 : vector<8x256xf32>
    %39 = vector.extract_strided_slice %2 {offsets = [0, 255], sizes = [4, 1], strides = [1, 1]} : vector<4x256xf32> to vector<4x1xf32>
    %40 = vector.extract_strided_slice %2 {offsets = [0, 0], sizes = [4, 255], strides = [1, 1]} : vector<4x256xf32> to vector<4x255xf32>
    %41 = tpu.concatenate %39, %40 in 1 : vector<4x1xf32>, vector<4x255xf32> -> vector<4x256xf32>
    %42 = vector.extract_strided_slice %0 {offsets = [3, 0], sizes = [1, 256], strides = [1, 1]} : vector<9x256xf32> to vector<1x256xf32>
    %43 = vector.broadcast %42 : vector<1x256xf32> to vector<4x256xf32>
    %44 = arith.mulf %41, %43 : vector<4x256xf32>
    %c3 = arith.constant 3 : index
    %c0_22 = arith.constant 0 : index
    %c0_23 = arith.constant 0 : index
    %45 = vector.load %arg3[%c3, %c0_22, %c0_23] : memref<9x8x4xf32, #tpu.memory_space<vmem>>, vector<1x8x4xf32>
    %46 = vector.shape_cast %45 : vector<1x8x4xf32> to vector<8x4xf32>
    %cst_24 = arith.constant dense<0.000000e+00> : vector<8x256xf32>
    %47 = tpu.matmul %46, %44, %cst_24 {dimension_numbers = #tpu.dot_dimension_numbers<[1], [0], [0], [1], [0, 0, 1, 1], [], []>} : vector<8x4xf32>, vector<4x256xf32>, vector<8x256xf32> -> vector<8x256xf32>
    %48 = arith.addf %38, %47 : vector<8x256xf32>
    %49 = vector.extract_strided_slice %2 {offsets = [0, 1], sizes = [4, 255], strides = [1, 1]} : vector<4x256xf32> to vector<4x255xf32>
    %50 = vector.extract_strided_slice %2 {offsets = [0, 0], sizes = [4, 1], strides = [1, 1]} : vector<4x256xf32> to vector<4x1xf32>
    %51 = tpu.concatenate %49, %50 in 1 : vector<4x255xf32>, vector<4x1xf32> -> vector<4x256xf32>
    %52 = vector.extract_strided_slice %0 {offsets = [5, 0], sizes = [1, 256], strides = [1, 1]} : vector<9x256xf32> to vector<1x256xf32>
    %53 = vector.broadcast %52 : vector<1x256xf32> to vector<4x256xf32>
    %54 = arith.mulf %51, %53 : vector<4x256xf32>
    %c5 = arith.constant 5 : index
    %c0_25 = arith.constant 0 : index
    %c0_26 = arith.constant 0 : index
    %55 = vector.load %arg3[%c5, %c0_25, %c0_26] : memref<9x8x4xf32, #tpu.memory_space<vmem>>, vector<1x8x4xf32>
    %56 = vector.shape_cast %55 : vector<1x8x4xf32> to vector<8x4xf32>
    %cst_27 = arith.constant dense<0.000000e+00> : vector<8x256xf32>
    %57 = tpu.matmul %56, %54, %cst_27 {dimension_numbers = #tpu.dot_dimension_numbers<[1], [0], [0], [1], [0, 0, 1, 1], [], []>} : vector<8x4xf32>, vector<4x256xf32>, vector<8x256xf32> -> vector<8x256xf32>
    %58 = arith.addf %48, %57 : vector<8x256xf32>
    %59 = vector.extract_strided_slice %2 {offsets = [0, 15], sizes = [4, 241], strides = [1, 1]} : vector<4x256xf32> to vector<4x241xf32>
    %60 = vector.extract_strided_slice %2 {offsets = [0, 0], sizes = [4, 15], strides = [1, 1]} : vector<4x256xf32> to vector<4x15xf32>
    %61 = tpu.concatenate %59, %60 in 1 : vector<4x241xf32>, vector<4x15xf32> -> vector<4x256xf32>
    %62 = vector.extract_strided_slice %0 {offsets = [6, 0], sizes = [1, 256], strides = [1, 1]} : vector<9x256xf32> to vector<1x256xf32>
    %63 = vector.broadcast %62 : vector<1x256xf32> to vector<4x256xf32>
    %64 = arith.mulf %61, %63 : vector<4x256xf32>
    %c6 = arith.constant 6 : index
    %c0_28 = arith.constant 0 : index
    %c0_29 = arith.constant 0 : index
    %65 = vector.load %arg3[%c6, %c0_28, %c0_29] : memref<9x8x4xf32, #tpu.memory_space<vmem>>, vector<1x8x4xf32>
    %66 = vector.shape_cast %65 : vector<1x8x4xf32> to vector<8x4xf32>
    %cst_30 = arith.constant dense<0.000000e+00> : vector<8x256xf32>
    %67 = tpu.matmul %66, %64, %cst_30 {dimension_numbers = #tpu.dot_dimension_numbers<[1], [0], [0], [1], [0, 0, 1, 1], [], []>} : vector<8x4xf32>, vector<4x256xf32>, vector<8x256xf32> -> vector<8x256xf32>
    %68 = arith.addf %58, %67 : vector<8x256xf32>
    %69 = vector.extract_strided_slice %2 {offsets = [0, 16], sizes = [4, 240], strides = [1, 1]} : vector<4x256xf32> to vector<4x240xf32>
    %70 = vector.extract_strided_slice %2 {offsets = [0, 0], sizes = [4, 16], strides = [1, 1]} : vector<4x256xf32> to vector<4x16xf32>
    %71 = tpu.concatenate %69, %70 in 1 : vector<4x240xf32>, vector<4x16xf32> -> vector<4x256xf32>
    %72 = vector.extract_strided_slice %0 {offsets = [7, 0], sizes = [1, 256], strides = [1, 1]} : vector<9x256xf32> to vector<1x256xf32>
    %73 = vector.broadcast %72 : vector<1x256xf32> to vector<4x256xf32>
    %74 = arith.mulf %71, %73 : vector<4x256xf32>
    %c7 = arith.constant 7 : index
    %c0_31 = arith.constant 0 : index
    %c0_32 = arith.constant 0 : index
    %75 = vector.load %arg3[%c7, %c0_31, %c0_32] : memref<9x8x4xf32, #tpu.memory_space<vmem>>, vector<1x8x4xf32>
    %76 = vector.shape_cast %75 : vector<1x8x4xf32> to vector<8x4xf32>
    %cst_33 = arith.constant dense<0.000000e+00> : vector<8x256xf32>
    %77 = tpu.matmul %76, %74, %cst_33 {dimension_numbers = #tpu.dot_dimension_numbers<[1], [0], [0], [1], [0, 0, 1, 1], [], []>} : vector<8x4xf32>, vector<4x256xf32>, vector<8x256xf32> -> vector<8x256xf32>
    %78 = arith.addf %68, %77 : vector<8x256xf32>
    %79 = vector.extract_strided_slice %2 {offsets = [0, 17], sizes = [4, 239], strides = [1, 1]} : vector<4x256xf32> to vector<4x239xf32>
    %80 = vector.extract_strided_slice %2 {offsets = [0, 0], sizes = [4, 17], strides = [1, 1]} : vector<4x256xf32> to vector<4x17xf32>
    %81 = tpu.concatenate %79, %80 in 1 : vector<4x239xf32>, vector<4x17xf32> -> vector<4x256xf32>
    %82 = vector.extract_strided_slice %0 {offsets = [8, 0], sizes = [1, 256], strides = [1, 1]} : vector<9x256xf32> to vector<1x256xf32>
    %83 = vector.broadcast %82 : vector<1x256xf32> to vector<4x256xf32>
    %84 = arith.mulf %81, %83 : vector<4x256xf32>
    %c8 = arith.constant 8 : index
    %c0_34 = arith.constant 0 : index
    %c0_35 = arith.constant 0 : index
    %85 = vector.load %arg3[%c8, %c0_34, %c0_35] : memref<9x8x4xf32, #tpu.memory_space<vmem>>, vector<1x8x4xf32>
    %86 = vector.shape_cast %85 : vector<1x8x4xf32> to vector<8x4xf32>
    %cst_36 = arith.constant dense<0.000000e+00> : vector<8x256xf32>
    %87 = tpu.matmul %86, %84, %cst_36 {dimension_numbers = #tpu.dot_dimension_numbers<[1], [0], [0], [1], [0, 0, 1, 1], [], []>} : vector<8x4xf32>, vector<4x256xf32>, vector<8x256xf32> -> vector<8x256xf32>
    %88 = arith.addf %78, %87 : vector<8x256xf32>
    %89 = vector.broadcast %3 : vector<8x1xf32> to vector<8x256xf32>
    %90 = arith.addf %88, %89 : vector<8x256xf32>
    %cst_37 = arith.constant dense<0.000000e+00> : vector<8xf32>
    %91 = vector.multi_reduction <add>, %90, %cst_37 [1] : vector<8x256xf32> to vector<8xf32>
    %92 = vector.shape_cast %91 : vector<8xf32> to vector<8x1xf32>
    %cst_38 = arith.constant 2.560000e+02 : f32
    %93 = vector.broadcast %cst_38 : f32 to vector<8x1xf32>
    %94 = arith.divf %92, %93 : vector<8x1xf32>
    %95 = vector.broadcast %94 : vector<8x1xf32> to vector<8x256xf32>
    %96 = arith.subf %90, %95 : vector<8x256xf32>
    %97 = arith.mulf %96, %96 : vector<8x256xf32>
    %cst_39 = arith.constant dense<0.000000e+00> : vector<8xf32>
    %98 = vector.multi_reduction <add>, %97, %cst_39 [1] : vector<8x256xf32> to vector<8xf32>
    %99 = vector.shape_cast %98 : vector<8xf32> to vector<8x1xf32>
    %cst_40 = arith.constant 2.560000e+02 : f32
    %100 = vector.broadcast %cst_40 : f32 to vector<8x1xf32>
    %101 = arith.divf %99, %100 : vector<8x1xf32>
    %cst_41 = arith.constant 9.99999974E-6 : f32
    %102 = vector.broadcast %cst_41 : f32 to vector<8x1xf32>
    %103 = arith.addf %101, %102 : vector<8x1xf32>
    %104 = math.rsqrt %103 : vector<8x1xf32>
    %105 = vector.broadcast %104 : vector<8x1xf32> to vector<8x256xf32>
    %106 = arith.mulf %96, %105 : vector<8x256xf32>
    %107 = vector.broadcast %4 : vector<8x1xf32> to vector<8x256xf32>
    %108 = arith.mulf %106, %107 : vector<8x256xf32>
    %109 = vector.broadcast %5 : vector<8x1xf32> to vector<8x256xf32>
    %110 = arith.addf %108, %109 : vector<8x256xf32>
    %cst_42 = arith.constant 0.707106769 : f32
    %111 = vector.broadcast %cst_42 : f32 to vector<8x256xf32>
    %112 = arith.mulf %110, %111 : vector<8x256xf32>
    %113 = math.absf %112 : vector<8x256xf32>
    %cst_43 = arith.constant 0.327591091 : f32
    %114 = vector.broadcast %cst_43 : f32 to vector<8x256xf32>
    %115 = arith.mulf %114, %113 : vector<8x256xf32>
    %cst_44 = arith.constant 1.000000e+00 : f32
    %116 = vector.broadcast %cst_44 : f32 to vector<8x256xf32>
    %117 = arith.addf %116, %115 : vector<8x256xf32>
    %118 = tpu.reciprocal %117 {approx = true} : vector<8x256xf32> -> vector<8x256xf32>
    %119 = arith.mulf %117, %118 : vector<8x256xf32>
    %cst_45 = arith.constant 2.000000e+00 : f32
    %120 = vector.broadcast %cst_45 : f32 to vector<8x256xf32>
    %121 = arith.subf %120, %119 : vector<8x256xf32>
    %122 = arith.mulf %118, %121 : vector<8x256xf32>
    %cst_46 = arith.constant 1.06140542 : f32
    %123 = vector.broadcast %cst_46 : f32 to vector<8x256xf32>
    %124 = arith.mulf %122, %123 : vector<8x256xf32>
    %cst_47 = arith.constant -1.45315206 : f32
    %125 = vector.broadcast %cst_47 : f32 to vector<8x256xf32>
    %126 = arith.addf %125, %124 : vector<8x256xf32>
    %127 = arith.mulf %122, %126 : vector<8x256xf32>
    %cst_48 = arith.constant 1.42141378 : f32
    %128 = vector.broadcast %cst_48 : f32 to vector<8x256xf32>
    %129 = arith.addf %128, %127 : vector<8x256xf32>
    %130 = arith.mulf %122, %129 : vector<8x256xf32>
    %cst_49 = arith.constant -0.284496725 : f32
    %131 = vector.broadcast %cst_49 : f32 to vector<8x256xf32>
    %132 = arith.addf %131, %130 : vector<8x256xf32>
    %133 = arith.mulf %122, %132 : vector<8x256xf32>
    %cst_50 = arith.constant 0.254829586 : f32
    %134 = vector.broadcast %cst_50 : f32 to vector<8x256xf32>
    %135 = arith.addf %134, %133 : vector<8x256xf32>
    %136 = arith.mulf %122, %135 : vector<8x256xf32>
    %cst_51 = arith.constant 0.000000e+00 : f32
    %137 = vector.broadcast %cst_51 : f32 to vector<8x256xf32>
    %138 = arith.subf %137, %113 : vector<8x256xf32>
    %139 = arith.mulf %138, %113 : vector<8x256xf32>
    %140 = math.exp %139 : vector<8x256xf32>
    %141 = arith.mulf %136, %140 : vector<8x256xf32>
    %cst_52 = arith.constant 1.000000e+00 : f32
    %142 = vector.broadcast %cst_52 : f32 to vector<8x256xf32>
    %143 = arith.subf %142, %141 : vector<8x256xf32>
    %cst_53 = arith.constant 0.000000e+00 : f32
    %144 = vector.broadcast %cst_53 : f32 to vector<8x256xf32>
    %145 = arith.cmpf oge, %112, %144 : vector<8x256xf32>
    %cst_54 = arith.constant 0.000000e+00 : f32
    %146 = vector.broadcast %cst_54 : f32 to vector<8x256xf32>
    %147 = arith.subf %146, %143 : vector<8x256xf32>
    %148 = arith.select %145, %143, %147 : vector<8x256xi1>, vector<8x256xf32>
    %cst_55 = arith.constant 5.000000e-01 : f32
    %149 = vector.broadcast %cst_55 : f32 to vector<8x256xf32>
    %150 = arith.mulf %149, %110 : vector<8x256xf32>
    %cst_56 = arith.constant 1.000000e+00 : f32
    %151 = vector.broadcast %cst_56 : f32 to vector<8x256xf32>
    %152 = arith.addf %151, %148 : vector<8x256xf32>
    %153 = arith.mulf %150, %152 : vector<8x256xf32>
    %c0_57 = arith.constant 0 : index
    %c0_58 = arith.constant 0 : index
    %154 = vector.load %arg8[%c0_57, %c0_58] : memref<8x1xf32, #tpu.memory_space<vmem>>, vector<8x1xf32>
    %c0_59 = arith.constant 0 : index
    %c0_60 = arith.constant 0 : index
    %155 = vector.load %arg9[%c0_59, %c0_60] : memref<8x1xf32, #tpu.memory_space<vmem>>, vector<8x1xf32>
    %c0_61 = arith.constant 0 : index
    %c0_62 = arith.constant 0 : index
    %156 = vector.load %arg10[%c0_61, %c0_62] : memref<8x1xf32, #tpu.memory_space<vmem>>, vector<8x1xf32>
    %c4_63 = arith.constant 4 : index
    %c0_64 = arith.constant 0 : index
    %c0_65 = arith.constant 0 : index
    %157 = vector.load %arg7[%c4_63, %c0_64, %c0_65] : memref<9x8x8xf32, #tpu.memory_space<vmem>>, vector<1x8x8xf32>
    %158 = vector.shape_cast %157 : vector<1x8x8xf32> to vector<8x8xf32>
    %cst_66 = arith.constant dense<0.000000e+00> : vector<8x256xf32>
    %159 = tpu.matmul %158, %153, %cst_66 {dimension_numbers = #tpu.dot_dimension_numbers<[1], [0], [0], [1], [0, 0, 1, 1], [], []>} : vector<8x8xf32>, vector<8x256xf32>, vector<8x256xf32> -> vector<8x256xf32>
    %160 = vector.extract_strided_slice %153 {offsets = [0, 239], sizes = [8, 17], strides = [1, 1]} : vector<8x256xf32> to vector<8x17xf32>
    %161 = vector.extract_strided_slice %153 {offsets = [0, 0], sizes = [8, 239], strides = [1, 1]} : vector<8x256xf32> to vector<8x239xf32>
    %162 = tpu.concatenate %160, %161 in 1 : vector<8x17xf32>, vector<8x239xf32> -> vector<8x256xf32>
    %163 = vector.extract_strided_slice %0 {offsets = [0, 0], sizes = [1, 256], strides = [1, 1]} : vector<9x256xf32> to vector<1x256xf32>
    %164 = vector.broadcast %163 : vector<1x256xf32> to vector<8x256xf32>
    %165 = arith.mulf %162, %164 : vector<8x256xf32>
    %c0_67 = arith.constant 0 : index
    %c0_68 = arith.constant 0 : index
    %c0_69 = arith.constant 0 : index
    %166 = vector.load %arg7[%c0_67, %c0_68, %c0_69] : memref<9x8x8xf32, #tpu.memory_space<vmem>>, vector<1x8x8xf32>
    %167 = vector.shape_cast %166 : vector<1x8x8xf32> to vector<8x8xf32>
    %cst_70 = arith.constant dense<0.000000e+00> : vector<8x256xf32>
    %168 = tpu.matmul %167, %165, %cst_70 {dimension_numbers = #tpu.dot_dimension_numbers<[1], [0], [0], [1], [0, 0, 1, 1], [], []>} : vector<8x8xf32>, vector<8x256xf32>, vector<8x256xf32> -> vector<8x256xf32>
    %169 = arith.addf %159, %168 : vector<8x256xf32>
    %170 = vector.extract_strided_slice %153 {offsets = [0, 240], sizes = [8, 16], strides = [1, 1]} : vector<8x256xf32> to vector<8x16xf32>
    %171 = vector.extract_strided_slice %153 {offsets = [0, 0], sizes = [8, 240], strides = [1, 1]} : vector<8x256xf32> to vector<8x240xf32>
    %172 = tpu.concatenate %170, %171 in 1 : vector<8x16xf32>, vector<8x240xf32> -> vector<8x256xf32>
    %173 = vector.extract_strided_slice %0 {offsets = [1, 0], sizes = [1, 256], strides = [1, 1]} : vector<9x256xf32> to vector<1x256xf32>
    %174 = vector.broadcast %173 : vector<1x256xf32> to vector<8x256xf32>
    %175 = arith.mulf %172, %174 : vector<8x256xf32>
    %c1_71 = arith.constant 1 : index
    %c0_72 = arith.constant 0 : index
    %c0_73 = arith.constant 0 : index
    %176 = vector.load %arg7[%c1_71, %c0_72, %c0_73] : memref<9x8x8xf32, #tpu.memory_space<vmem>>, vector<1x8x8xf32>
    %177 = vector.shape_cast %176 : vector<1x8x8xf32> to vector<8x8xf32>
    %cst_74 = arith.constant dense<0.000000e+00> : vector<8x256xf32>
    %178 = tpu.matmul %177, %175, %cst_74 {dimension_numbers = #tpu.dot_dimension_numbers<[1], [0], [0], [1], [0, 0, 1, 1], [], []>} : vector<8x8xf32>, vector<8x256xf32>, vector<8x256xf32> -> vector<8x256xf32>
    %179 = arith.addf %169, %178 : vector<8x256xf32>
    %180 = vector.extract_strided_slice %153 {offsets = [0, 241], sizes = [8, 15], strides = [1, 1]} : vector<8x256xf32> to vector<8x15xf32>
    %181 = vector.extract_strided_slice %153 {offsets = [0, 0], sizes = [8, 241], strides = [1, 1]} : vector<8x256xf32> to vector<8x241xf32>
    %182 = tpu.concatenate %180, %181 in 1 : vector<8x15xf32>, vector<8x241xf32> -> vector<8x256xf32>
    %183 = vector.extract_strided_slice %0 {offsets = [2, 0], sizes = [1, 256], strides = [1, 1]} : vector<9x256xf32> to vector<1x256xf32>
    %184 = vector.broadcast %183 : vector<1x256xf32> to vector<8x256xf32>
    %185 = arith.mulf %182, %184 : vector<8x256xf32>
    %c2_75 = arith.constant 2 : index
    %c0_76 = arith.constant 0 : index
    %c0_77 = arith.constant 0 : index
    %186 = vector.load %arg7[%c2_75, %c0_76, %c0_77] : memref<9x8x8xf32, #tpu.memory_space<vmem>>, vector<1x8x8xf32>
    %187 = vector.shape_cast %186 : vector<1x8x8xf32> to vector<8x8xf32>
    %cst_78 = arith.constant dense<0.000000e+00> : vector<8x256xf32>
    %188 = tpu.matmul %187, %185, %cst_78 {dimension_numbers = #tpu.dot_dimension_numbers<[1], [0], [0], [1], [0, 0, 1, 1], [], []>} : vector<8x8xf32>, vector<8x256xf32>, vector<8x256xf32> -> vector<8x256xf32>
    %189 = arith.addf %179, %188 : vector<8x256xf32>
    %190 = vector.extract_strided_slice %153 {offsets = [0, 255], sizes = [8, 1], strides = [1, 1]} : vector<8x256xf32> to vector<8x1xf32>
    %191 = vector.extract_strided_slice %153 {offsets = [0, 0], sizes = [8, 255], strides = [1, 1]} : vector<8x256xf32> to vector<8x255xf32>
    %192 = tpu.concatenate %190, %191 in 1 : vector<8x1xf32>, vector<8x255xf32> -> vector<8x256xf32>
    %193 = vector.extract_strided_slice %0 {offsets = [3, 0], sizes = [1, 256], strides = [1, 1]} : vector<9x256xf32> to vector<1x256xf32>
    %194 = vector.broadcast %193 : vector<1x256xf32> to vector<8x256xf32>
    %195 = arith.mulf %192, %194 : vector<8x256xf32>
    %c3_79 = arith.constant 3 : index
    %c0_80 = arith.constant 0 : index
    %c0_81 = arith.constant 0 : index
    %196 = vector.load %arg7[%c3_79, %c0_80, %c0_81] : memref<9x8x8xf32, #tpu.memory_space<vmem>>, vector<1x8x8xf32>
    %197 = vector.shape_cast %196 : vector<1x8x8xf32> to vector<8x8xf32>
    %cst_82 = arith.constant dense<0.000000e+00> : vector<8x256xf32>
    %198 = tpu.matmul %197, %195, %cst_82 {dimension_numbers = #tpu.dot_dimension_numbers<[1], [0], [0], [1], [0, 0, 1, 1], [], []>} : vector<8x8xf32>, vector<8x256xf32>, vector<8x256xf32> -> vector<8x256xf32>
    %199 = arith.addf %189, %198 : vector<8x256xf32>
    %200 = vector.extract_strided_slice %153 {offsets = [0, 1], sizes = [8, 255], strides = [1, 1]} : vector<8x256xf32> to vector<8x255xf32>
    %201 = vector.extract_strided_slice %153 {offsets = [0, 0], sizes = [8, 1], strides = [1, 1]} : vector<8x256xf32> to vector<8x1xf32>
    %202 = tpu.concatenate %200, %201 in 1 : vector<8x255xf32>, vector<8x1xf32> -> vector<8x256xf32>
    %203 = vector.extract_strided_slice %0 {offsets = [5, 0], sizes = [1, 256], strides = [1, 1]} : vector<9x256xf32> to vector<1x256xf32>
    %204 = vector.broadcast %203 : vector<1x256xf32> to vector<8x256xf32>
    %205 = arith.mulf %202, %204 : vector<8x256xf32>
    %c5_83 = arith.constant 5 : index
    %c0_84 = arith.constant 0 : index
    %c0_85 = arith.constant 0 : index
    %206 = vector.load %arg7[%c5_83, %c0_84, %c0_85] : memref<9x8x8xf32, #tpu.memory_space<vmem>>, vector<1x8x8xf32>
    %207 = vector.shape_cast %206 : vector<1x8x8xf32> to vector<8x8xf32>
    %cst_86 = arith.constant dense<0.000000e+00> : vector<8x256xf32>
    %208 = tpu.matmul %207, %205, %cst_86 {dimension_numbers = #tpu.dot_dimension_numbers<[1], [0], [0], [1], [0, 0, 1, 1], [], []>} : vector<8x8xf32>, vector<8x256xf32>, vector<8x256xf32> -> vector<8x256xf32>
    %209 = arith.addf %199, %208 : vector<8x256xf32>
    %210 = vector.extract_strided_slice %153 {offsets = [0, 15], sizes = [8, 241], strides = [1, 1]} : vector<8x256xf32> to vector<8x241xf32>
    %211 = vector.extract_strided_slice %153 {offsets = [0, 0], sizes = [8, 15], strides = [1, 1]} : vector<8x256xf32> to vector<8x15xf32>
    %212 = tpu.concatenate %210, %211 in 1 : vector<8x241xf32>, vector<8x15xf32> -> vector<8x256xf32>
    %213 = vector.extract_strided_slice %0 {offsets = [6, 0], sizes = [1, 256], strides = [1, 1]} : vector<9x256xf32> to vector<1x256xf32>
    %214 = vector.broadcast %213 : vector<1x256xf32> to vector<8x256xf32>
    %215 = arith.mulf %212, %214 : vector<8x256xf32>
    %c6_87 = arith.constant 6 : index
    %c0_88 = arith.constant 0 : index
    %c0_89 = arith.constant 0 : index
    %216 = vector.load %arg7[%c6_87, %c0_88, %c0_89] : memref<9x8x8xf32, #tpu.memory_space<vmem>>, vector<1x8x8xf32>
    %217 = vector.shape_cast %216 : vector<1x8x8xf32> to vector<8x8xf32>
    %cst_90 = arith.constant dense<0.000000e+00> : vector<8x256xf32>
    %218 = tpu.matmul %217, %215, %cst_90 {dimension_numbers = #tpu.dot_dimension_numbers<[1], [0], [0], [1], [0, 0, 1, 1], [], []>} : vector<8x8xf32>, vector<8x256xf32>, vector<8x256xf32> -> vector<8x256xf32>
    %219 = arith.addf %209, %218 : vector<8x256xf32>
    %220 = vector.extract_strided_slice %153 {offsets = [0, 16], sizes = [8, 240], strides = [1, 1]} : vector<8x256xf32> to vector<8x240xf32>
    %221 = vector.extract_strided_slice %153 {offsets = [0, 0], sizes = [8, 16], strides = [1, 1]} : vector<8x256xf32> to vector<8x16xf32>
    %222 = tpu.concatenate %220, %221 in 1 : vector<8x240xf32>, vector<8x16xf32> -> vector<8x256xf32>
    %223 = vector.extract_strided_slice %0 {offsets = [7, 0], sizes = [1, 256], strides = [1, 1]} : vector<9x256xf32> to vector<1x256xf32>
    %224 = vector.broadcast %223 : vector<1x256xf32> to vector<8x256xf32>
    %225 = arith.mulf %222, %224 : vector<8x256xf32>
    %c7_91 = arith.constant 7 : index
    %c0_92 = arith.constant 0 : index
    %c0_93 = arith.constant 0 : index
    %226 = vector.load %arg7[%c7_91, %c0_92, %c0_93] : memref<9x8x8xf32, #tpu.memory_space<vmem>>, vector<1x8x8xf32>
    %227 = vector.shape_cast %226 : vector<1x8x8xf32> to vector<8x8xf32>
    %cst_94 = arith.constant dense<0.000000e+00> : vector<8x256xf32>
    %228 = tpu.matmul %227, %225, %cst_94 {dimension_numbers = #tpu.dot_dimension_numbers<[1], [0], [0], [1], [0, 0, 1, 1], [], []>} : vector<8x8xf32>, vector<8x256xf32>, vector<8x256xf32> -> vector<8x256xf32>
    %229 = arith.addf %219, %228 : vector<8x256xf32>
    %230 = vector.extract_strided_slice %153 {offsets = [0, 17], sizes = [8, 239], strides = [1, 1]} : vector<8x256xf32> to vector<8x239xf32>
    %231 = vector.extract_strided_slice %153 {offsets = [0, 0], sizes = [8, 17], strides = [1, 1]} : vector<8x256xf32> to vector<8x17xf32>
    %232 = tpu.concatenate %230, %231 in 1 : vector<8x239xf32>, vector<8x17xf32> -> vector<8x256xf32>
    %233 = vector.extract_strided_slice %0 {offsets = [8, 0], sizes = [1, 256], strides = [1, 1]} : vector<9x256xf32> to vector<1x256xf32>
    %234 = vector.broadcast %233 : vector<1x256xf32> to vector<8x256xf32>
    %235 = arith.mulf %232, %234 : vector<8x256xf32>
    %c8_95 = arith.constant 8 : index
    %c0_96 = arith.constant 0 : index
    %c0_97 = arith.constant 0 : index
    %236 = vector.load %arg7[%c8_95, %c0_96, %c0_97] : memref<9x8x8xf32, #tpu.memory_space<vmem>>, vector<1x8x8xf32>
    %237 = vector.shape_cast %236 : vector<1x8x8xf32> to vector<8x8xf32>
    %cst_98 = arith.constant dense<0.000000e+00> : vector<8x256xf32>
    %238 = tpu.matmul %237, %235, %cst_98 {dimension_numbers = #tpu.dot_dimension_numbers<[1], [0], [0], [1], [0, 0, 1, 1], [], []>} : vector<8x8xf32>, vector<8x256xf32>, vector<8x256xf32> -> vector<8x256xf32>
    %239 = arith.addf %229, %238 : vector<8x256xf32>
    %240 = vector.broadcast %154 : vector<8x1xf32> to vector<8x256xf32>
    %241 = arith.addf %239, %240 : vector<8x256xf32>
    %cst_99 = arith.constant dense<0.000000e+00> : vector<8xf32>
    %242 = vector.multi_reduction <add>, %241, %cst_99 [1] : vector<8x256xf32> to vector<8xf32>
    %243 = vector.shape_cast %242 : vector<8xf32> to vector<8x1xf32>
    %cst_100 = arith.constant 2.560000e+02 : f32
    %244 = vector.broadcast %cst_100 : f32 to vector<8x1xf32>
    %245 = arith.divf %243, %244 : vector<8x1xf32>
    %246 = vector.broadcast %245 : vector<8x1xf32> to vector<8x256xf32>
    %247 = arith.subf %241, %246 : vector<8x256xf32>
    %248 = arith.mulf %247, %247 : vector<8x256xf32>
    %cst_101 = arith.constant dense<0.000000e+00> : vector<8xf32>
    %249 = vector.multi_reduction <add>, %248, %cst_101 [1] : vector<8x256xf32> to vector<8xf32>
    %250 = vector.shape_cast %249 : vector<8xf32> to vector<8x1xf32>
    %cst_102 = arith.constant 2.560000e+02 : f32
    %251 = vector.broadcast %cst_102 : f32 to vector<8x1xf32>
    %252 = arith.divf %250, %251 : vector<8x1xf32>
    %cst_103 = arith.constant 9.99999974E-6 : f32
    %253 = vector.broadcast %cst_103 : f32 to vector<8x1xf32>
    %254 = arith.addf %252, %253 : vector<8x1xf32>
    %255 = math.rsqrt %254 : vector<8x1xf32>
    %256 = vector.broadcast %255 : vector<8x1xf32> to vector<8x256xf32>
    %257 = arith.mulf %247, %256 : vector<8x256xf32>
    %258 = vector.broadcast %155 : vector<8x1xf32> to vector<8x256xf32>
    %259 = arith.mulf %257, %258 : vector<8x256xf32>
    %260 = vector.broadcast %156 : vector<8x1xf32> to vector<8x256xf32>
    %261 = arith.addf %259, %260 : vector<8x256xf32>
    %cst_104 = arith.constant 0.707106769 : f32
    %262 = vector.broadcast %cst_104 : f32 to vector<8x256xf32>
    %263 = arith.mulf %261, %262 : vector<8x256xf32>
    %264 = math.absf %263 : vector<8x256xf32>
    %cst_105 = arith.constant 0.327591091 : f32
    %265 = vector.broadcast %cst_105 : f32 to vector<8x256xf32>
    %266 = arith.mulf %265, %264 : vector<8x256xf32>
    %cst_106 = arith.constant 1.000000e+00 : f32
    %267 = vector.broadcast %cst_106 : f32 to vector<8x256xf32>
    %268 = arith.addf %267, %266 : vector<8x256xf32>
    %269 = tpu.reciprocal %268 {approx = true} : vector<8x256xf32> -> vector<8x256xf32>
    %270 = arith.mulf %268, %269 : vector<8x256xf32>
    %cst_107 = arith.constant 2.000000e+00 : f32
    %271 = vector.broadcast %cst_107 : f32 to vector<8x256xf32>
    %272 = arith.subf %271, %270 : vector<8x256xf32>
    %273 = arith.mulf %269, %272 : vector<8x256xf32>
    %cst_108 = arith.constant 1.06140542 : f32
    %274 = vector.broadcast %cst_108 : f32 to vector<8x256xf32>
    %275 = arith.mulf %273, %274 : vector<8x256xf32>
    %cst_109 = arith.constant -1.45315206 : f32
    %276 = vector.broadcast %cst_109 : f32 to vector<8x256xf32>
    %277 = arith.addf %276, %275 : vector<8x256xf32>
    %278 = arith.mulf %273, %277 : vector<8x256xf32>
    %cst_110 = arith.constant 1.42141378 : f32
    %279 = vector.broadcast %cst_110 : f32 to vector<8x256xf32>
    %280 = arith.addf %279, %278 : vector<8x256xf32>
    %281 = arith.mulf %273, %280 : vector<8x256xf32>
    %cst_111 = arith.constant -0.284496725 : f32
    %282 = vector.broadcast %cst_111 : f32 to vector<8x256xf32>
    %283 = arith.addf %282, %281 : vector<8x256xf32>
    %284 = arith.mulf %273, %283 : vector<8x256xf32>
    %cst_112 = arith.constant 0.254829586 : f32
    %285 = vector.broadcast %cst_112 : f32 to vector<8x256xf32>
    %286 = arith.addf %285, %284 : vector<8x256xf32>
    %287 = arith.mulf %273, %286 : vector<8x256xf32>
    %cst_113 = arith.constant 0.000000e+00 : f32
    %288 = vector.broadcast %cst_113 : f32 to vector<8x256xf32>
    %289 = arith.subf %288, %264 : vector<8x256xf32>
    %290 = arith.mulf %289, %264 : vector<8x256xf32>
    %291 = math.exp %290 : vector<8x256xf32>
    %292 = arith.mulf %287, %291 : vector<8x256xf32>
    %cst_114 = arith.constant 1.000000e+00 : f32
    %293 = vector.broadcast %cst_114 : f32 to vector<8x256xf32>
    %294 = arith.subf %293, %292 : vector<8x256xf32>
    %cst_115 = arith.constant 0.000000e+00 : f32
    %295 = vector.broadcast %cst_115 : f32 to vector<8x256xf32>
    %296 = arith.cmpf oge, %263, %295 : vector<8x256xf32>
    %cst_116 = arith.constant 0.000000e+00 : f32
    %297 = vector.broadcast %cst_116 : f32 to vector<8x256xf32>
    %298 = arith.subf %297, %294 : vector<8x256xf32>
    %299 = arith.select %296, %294, %298 : vector<8x256xi1>, vector<8x256xf32>
    %cst_117 = arith.constant 5.000000e-01 : f32
    %300 = vector.broadcast %cst_117 : f32 to vector<8x256xf32>
    %301 = arith.mulf %300, %261 : vector<8x256xf32>
    %cst_118 = arith.constant 1.000000e+00 : f32
    %302 = vector.broadcast %cst_118 : f32 to vector<8x256xf32>
    %303 = arith.addf %302, %299 : vector<8x256xf32>
    %304 = arith.mulf %301, %303 : vector<8x256xf32>
    %c0_119 = arith.constant 0 : index
    %c0_120 = arith.constant 0 : index
    %c0_121 = arith.constant 0 : index
    %305 = vector.load %arg11[%c0_119, %c0_120, %c0_121] : memref<1x8x256xf32, #tpu.memory_space<vmem>>, vector<1x8x256xf32>
    %306 = vector.shape_cast %305 : vector<1x8x256xf32> to vector<8x256xf32>
    %307 = vector.shape_cast %304 : vector<8x256xf32> to vector<1x8x256xf32>
    tpu.vector_store %arg11[%c0_119, %c0_120, %c0_121], %307 {strides = array<i32>} : memref<1x8x256xf32, #tpu.memory_space<vmem>>, vector<1x8x256xf32>,
    return
  }
  func.func @transform_0(%arg0: i32) -> (i32, i32, i32) {
    %c0_i32 = arith.constant 0 : i32
    %c0_i32_0 = arith.constant 0 : i32
    %c0_i32_1 = arith.constant 0 : i32
    return %arg0, %c0_i32, %c0_i32_0 : i32, i32, i32
  }
  func.func @transform_1(%arg0: i32) -> (i32, i32) {
    %c0_i32 = arith.constant 0 : i32
    %c0_i32_0 = arith.constant 0 : i32
    %c0_i32_1 = arith.constant 0 : i32
    return %c0_i32, %c0_i32_0 : i32, i32
  }
  func.func @transform_2(%arg0: i32) -> (i32, i32, i32) {
    %c0_i32 = arith.constant 0 : i32
    %c0_i32_0 = arith.constant 0 : i32
    %c0_i32_1 = arith.constant 0 : i32
    %c0_i32_2 = arith.constant 0 : i32
    return %c0_i32, %c0_i32_0, %c0_i32_1 : i32, i32, i32
  }
  func.func @transform_3(%arg0: i32) -> (i32, i32) {
    %c0_i32 = arith.constant 0 : i32
    %c0_i32_0 = arith.constant 0 : i32
    %c0_i32_1 = arith.constant 0 : i32
    return %c0_i32, %c0_i32_0 : i32, i32
  }
  func.func @transform_4(%arg0: i32) -> (i32, i32) {
    %c0_i32 = arith.constant 0 : i32
    %c0_i32_0 = arith.constant 0 : i32
    %c0_i32_1 = arith.constant 0 : i32
    return %c0_i32, %c0_i32_0 : i32, i32
  }
  func.func @transform_5(%arg0: i32) -> (i32, i32) {
    %c0_i32 = arith.constant 0 : i32
    %c0_i32_0 = arith.constant 0 : i32
    %c0_i32_1 = arith.constant 0 : i32
    return %c0_i32, %c0_i32_0 : i32, i32
  }
  func.func @transform_6(%arg0: i32) -> (i32, i32, i32) {
    %c0_i32 = arith.constant 0 : i32
    %c0_i32_0 = arith.constant 0 : i32
    %c0_i32_1 = arith.constant 0 : i32
    %c0_i32_2 = arith.constant 0 : i32
    return %c0_i32, %c0_i32_0, %c0_i32_1 : i32, i32, i32
  }
  func.func @transform_7(%arg0: i32) -> (i32, i32) {
    %c0_i32 = arith.constant 0 : i32
    %c0_i32_0 = arith.constant 0 : i32
    %c0_i32_1 = arith.constant 0 : i32
    return %c0_i32, %c0_i32_0 : i32, i32
  }
  func.func @transform_8(%arg0: i32) -> (i32, i32) {
    %c0_i32 = arith.constant 0 : i32
    %c0_i32_0 = arith.constant 0 : i32
    %c0_i32_1 = arith.constant 0 : i32
    return %c0_i32, %c0_i32_0 : i32, i32
  }
  func.func @transform_9(%arg0: i32) -> (i32, i32) {
    %c0_i32 = arith.constant 0 : i32
    %c0_i32_0 = arith.constant 0 : i32
    %c0_i32_1 = arith.constant 0 : i32
    return %c0_i32, %c0_i32_0 : i32, i32
  }
  func.func @transform_10(%arg0: i32) -> (i32, i32, i32) {
    %c0_i32 = arith.constant 0 : i32
    %c0_i32_0 = arith.constant 0 : i32
    %c0_i32_1 = arith.constant 0 : i32
    return %arg0, %c0_i32, %c0_i32_0 : i32, i32, i32
  }
}

</mosaic_0001>

<bundles_post_ra>
// kernel: tpu_custom_call.1
= control target key start
LH: loop header
LB: loop body
LE: loop exit
PB: predicated region body
PF: predicated region fallthrough
CT: control target
= control target key end

     0   :  { %15 = vsyncpa [#allocation3], 0  ;;  %s3049_s0 = inlined_call_operand.vmem [shape: f32[2,4,256], index: 0, kind: input, shape index: {}]   ;;  %s3050_s1 = inlined_call_operand.vmem [shape: f32[9,256], index: 1, kind: input, shape index: {}]   ;;  %s3051_s2 = inlined_call_operand.vmem [shape: f32[9,8,4], index: 2, kind: input, shape index: {}]   ;;  %s3052_s3 = inlined_call_operand.vmem [shape: f32[8,1], index: 3, kind: input, shape index: {}]   ;;  %s3053_s4 = inlined_call_operand.vmem [shape: f32[8,1], index: 4, kind: input, shape index: {}]   ;;  %s3054_s5 = inlined_call_operand.vmem [shape: f32[8,1], index: 5, kind: input, shape index: {}]   ;;  %s3055_s6 = inlined_call_operand.vmem [shape: f32[9,8,8], index: 6, kind: input, shape index: {}]   ;;  %s3056_s7 = inlined_call_operand.vmem [shape: f32[8,1], index: 7, kind: input, shape index: {}]   ;;  %s3057_s8 = inlined_call_operand.vmem [shape: f32[8,1], index: 8, kind: input, shape index: {}]   ;;  %s3058_s9 = inlined_call_operand.vmem [shape: f32[8,1], index: 9, kind: input, shape index: {}]   ;;  %s3059_s10 = inlined_call_operand.hbm [shape: f32[2,8,256], index: 10, kind: output, shape index: {}]  }
   0x1   :  { %17 = vsyncpa [#allocation3 + $0x1], 0  ;;  %s2639_s13 = smov 0   ;;  %s2641_s14 = smov 0  }
   0x2   :  { %s2643_s15 = smov 0   ;;  %s2645_s16 = smov 0  }
   0x3 LB: > { %s2660_s17 = sadd.s32 4294967295, %s2571_s16   ;;  %s2337_s18 = sadd.s32 4294967294, %s2571_s16   ;;  %s2571_s16 = sphi %s2645_s16, %s3074_s16   ;;  %s2567_s15 = sphi %s2643_s15, %s3073_s15   ;;  %s2563_s14 = sphi %s2641_s14, %s3072_s14   ;;  %s2559_s13 = sphi %s2639_s13, %s3071_s13  }
   0x4   : > { %s2664_s19 = sadd.s32 1, %s2571_s16   ;;  %s245_s20 = sadd.s32 1, %s2567_s15 }
   0x5   : > { %s242_s21 = ssub.s32 %s2571_s16, %s2664_s19  ;;  %p255_p0 = scmp.ne.s32.totalorder %s2567_s15, %s2563_s14 }
   0x6   : > { %p243_p1 = scmp.eq.s32.totalorder %s242_s21, 0  ;;  %p256_p2 = scmp.eq.s32.totalorder %s2660_s17, 1 }
   0x7   : > { %p261_p3 = scmp.ne.s32.totalorder %s2563_s14, %s2559_s13  ;;  %p262_p4 = scmp.eq.s32.totalorder %s2337_s18, 1 }
   0x8   : > { %s2675_s22 = scalar_select %p243_p1, %s2567_s15, %s245_s20  }
   0x9   : > { %p2677_p5 = por %p256_p2, %p255_p0  ;;  %p2681_p6 = por %p262_p4, %p261_p3 }
   0xa   : > { %p2340_p7 = scmp.ge.s32.totalorder %s2571_s16, 1  ;;  %p315_p8 = scmp.lt.s32.totalorder %s2571_s16, 3 }
   0xc   : > { %p316_p9 = pnand %p2340_p7, %p315_p8 }
   0xd   : > { %p353_p10 = scmp.lt.s32.totalorder (!%p316_p9), %s2660_s17, 1  ;;  %v2573_v0 = vmov (!%p316_p9), 0.0   ;;  %s2574_s30 = smov (!%p316_p9), 17   ;;  %v363_v3 = vld [vmem:[%s3052_s3] sm:$0xff] (!%p316_p9)  ;;  %v2582_v4 = vmov (!%p316_p9), 0   ;;  %v380_v5 = vlaneseq (!%p316_p9)  ;;  %v2736_v9 = vld [vmem:[%s3050_s1 + $0x8] sm:$0xff] (!%p316_p9) }
   0xe   : > { %319 = sbr.rel (%p316_p9) target bundleno = 1588 (0x634), region = 60  ;;  %466 = vmatprep.mubr.f32.mxu0 (!%p316_p9), %v2573_v0  ;;  %1462 = vmatprep.mubr.f32.mxu1 (!%p316_p9), %v2573_v0  ;;  %s2575_s11 = smov (!%p316_p9), 16   ;;  %v2731_v8 = vld [vmem:[%s3050_s1] sm:$0xff] (!%p316_p9)  ;;  %vm375_vm0 = vcmask (!%p316_p9), 138240   ;;  %vm556_vm1 = vcmask (!%p316_p9), 130048   ;;  %vm395_vm2 = vcmask (!%p316_p9), 1043456  }
   0xf   : > { %s2576_s12 = smov (!%p316_p9), 15   ;;  %s2577_s18 = smov (!%p316_p9), 1   ;;  %2486 = vset.pattern.permute.xlu0 (!%p316_p9), %v2582_v4  ;;  %2487 = vset.pattern.permute.xlu1 (!%p316_p9), %v2582_v4  ;;  %v2725_v6 = vshrl.u32 (!%p316_p9), %v380_v5, 7  ;;  %v390_v23 = vld [vmem:[%s3051_s2] sm:$0xff] (!%p316_p9)  ;;  %vm391_vm3 = vcmask (!%p316_p9), 31744   ;;  %vm660_vm4 = vcmask (!%p316_p9), 121856  }
  0x10   : > { %s2578_s20 = smov (!%p316_p9), 127   ;;  %s3062_s21 = smov (!%p316_p9), 113   ;;  %v2344_v33 = vld [vmem:[%s3051_s2 + $0x20] sm:$0xff] (!%p316_p9)  ;;  %vm764_vm5 = vcmask (!%p316_p9), 7168   ;;  %v2351_v43 = vld [vmem:[%s3051_s2 + $0x8] sm:$0xff] (!%p316_p9)  ;;  %vm867_vm6 = vcmask (!%p316_p9), 1039360  }
  0x11   : > { %v382_v7 = vsub.s32 (!%p316_p9), 0, %v2725_v6  ;;  %v563_v12 = vsub.s32 (!%p316_p9), 1, %v2725_v6  ;;  %v667_v25 = vsub.s32 (!%p316_p9), 2, %v2725_v6  ;;  %v771_v35 = vsub.s32 (!%p316_p9), 3, %v2725_v6  ;;  %v2355_v53 = vld [vmem:[%s3051_s2 + $0x10] sm:$0xff] (!%p316_p9)  ;;  %v2359_v63 = vld [vmem:[%s3051_s2 + $0x18] sm:$0xff] (!%p316_p9) }
  0x12   : > { %v875_v45 = vsub.s32 (!%p316_p9), 5, %v2725_v6  ;;  %v979_v55 = vsub.s32 (!%p316_p9), 6, %v2725_v6  ;;  %vm971_vm7 = vcmask (!%p316_p9), 924672   ;;  %vm1075_vm8 = vcmask (!%p316_p9), 916480   ;;  %s3069_s27 = smov (!%p316_p9), 112   ;;  %s3070_s28 = smov (!%p316_p9), 111  }
  0x13   : > { %v2740_v13 = vrot.slane (!%p316_p9), %v2731_v8, %v382_v7  ;;  %v2743_v14 = vrot.slane (!%p316_p9), %v2736_v9, %v382_v7  ;;  %v2746_v16 = vrot.slane (!%p316_p9), %v2736_v9, %v563_v12  ;;  %v2763_v28 = vrot.slane (!%p316_p9), %v2731_v8, %v563_v12  ;;  %v2363_v12 = vld [vmem:[%s3051_s2 + $0x28] sm:$0xff] (!%p316_p9) }
  0x14   : > { %v2771_v30 = vrot.slane (!%p316_p9), %v2736_v9, %v667_v25  ;;  %v2783_v38 = vrot.slane (!%p316_p9), %v2731_v8, %v667_v25  ;;  %v2789_v40 = vrot.slane (!%p316_p9), %v2736_v9, %v771_v35  ;;  %v2801_v48 = vrot.slane (!%p316_p9), %v2731_v8, %v771_v35 }
  0x15   : > { %s354_s25 = scalar_select %p353_p10, %s2660_s17, 1  ;;  %v2807_v50 = vrot.slane %v2736_v9, %v875_v45  ;;  %v2819_v58 = vrot.slane %v2731_v8, %v875_v45  ;;  %v2825_v60 = vrot.slane %v2736_v9, %v979_v55  ;;  %v2837_v5 = vrot.slane %v2731_v8, %v979_v55 }
  0x16   : > { %vm1179_vm9 = vcmask 908288   ;;  %vm1394_vm12 = vcmask 64512  }
  0x17   : > { %s2403_s26 = sshll.u32 %s354_s25, 3  ;;  %s3060_s25 = smov 112  }
  0x18   : > { %s357_s29 = scalar_lea.vmem %s3049_s0, %s2403_s26  ;;  %s3064_s26 = smov 111  }
  0x19   : > { %v2694_v1 = vld [vmem:[%s357_s29] sm:$0xff] }
  0x1a   : > { %v369_v2 = vcombine.high %v2694_v1, %v2694_v1 }
  0x1c   : > { %370 = vrot.lane.b32.xlu0 %v369_v2, %s2574_s30  ;;  %551 = vrot.lane.b32.xlu1 %v369_v2, %s2575_s11 }
  0x20   : > { %373 = vrot.lane.b32.xlu0 %v2694_v1, %s2574_s30  ;;  %554 = vrot.lane.b32.xlu1 %v2694_v1, %s2575_s11 }
  0x24   : > { %658 = vrot.lane.b32.xlu1 %v2694_v1, %s2576_s12  ;;  %655 = vrot.lane.b32.xlu0 %v369_v2, %s2576_s12 }
  0x28   : > { %762 = vrot.lane.b32.xlu1 %v2694_v1, %s2577_s18  ;;  %759 = vrot.lane.b32.xlu0 %v369_v2, %s2577_s18 }
  0x2c   : > { %865 = vrot.lane.b32.xlu1 %v369_v2, %s2578_s20  ;;  %863 = vrot.lane.b32.xlu0 %v2694_v1, %s2578_s20 }
  0x30   : > { %969 = vrot.lane.b32.xlu1 %v369_v2, %s3062_s21  ;;  %967 = vrot.lane.b32.xlu0 %v2694_v1, %s3062_s21 }
  0x34   : > { %1073 = vrot.lane.b32.xlu1 %v369_v2, %s3060_s25  ;;  %1071 = vrot.lane.b32.xlu0 %v2694_v1, %s3060_s25 }
  0x38   : > { %1177 = vrot.lane.b32.xlu1 %v369_v2, %s3064_s26  ;;  %1175 = vrot.lane.b32.xlu0 %v2694_v1, %s3064_s26  ;;  %s3068_s26 = smov 113  }
  0x3c   : > { %1281 = vperm.xlu0 %2486, %v363_v3  }
  0x8e   : > { %v371_v10 = vpop.permute.xlu0 %370  ;;  %v552_v11 = vpop.permute.xlu1 %551 }
  0x92   : > { %v374_v15 = vpop.permute.xlu0 %373  ;;  %v555_v17 = vpop.permute.xlu1 %554 }
  0x93   : > { %v376_v18 = vsel %vm375_vm0, %v374_v15, %v371_v10  ;;  %v379_v19 = vsel %vm375_vm0, %v371_v10, %v374_v15  ;;  %v557_v20 = vsel %vm556_vm1, %v555_v17, %v552_v11  ;;  %v560_v29 = vsel %vm556_vm1, %v552_v11, %v555_v17 }
  0x94   : > { %v388_v21 = vmul.f32 %v2740_v13, %v379_v19  ;;  %v389_v22 = vmul.f32 %v2743_v14, %v376_v18  ;;  %v570_v24 = vmul.f32 %v2746_v16, %v557_v20  ;;  %v569_v32 = vmul.f32 %v2763_v28, %v560_v29  ;;  %v2862_v20 = vld [vmem:[%s3050_s1 + $0x18] ss:$0 sm:$0xff]  ;;  %v2377_v29 = vld [vmem:[%s3051_s2 + $0x40] sm:$0xff] }
  0x96   : > { %2345 = vmatprep.subr.msk.mxu0 %vm395_vm2, %v389_v22  ;;  %v659_v26 = vpop.permute.xlu1 %658  ;;  %v656_v27 = vpop.permute.xlu0 %655 }
  0x97   : > { %2346 = vmatpush1.msk.msra.mxu0 %vm395_vm2, %v388_v21  ;;  %v661_v31 = vsel %vm660_vm4, %v659_v26, %v656_v27  ;;  %v664_v39 = vsel %vm660_vm4, %v656_v27, %v659_v26  ;;  %v2371_v27 = vld [vmem:[%s3051_s2 + $0x38] sm:$0xff] }
  0x98   : > { %2347 = vmatmul.mubr.msk.f32.vlgmr.msra.gmra.mrb[0].mxu0 %vm391_vm3, %v390_v23  ;;  %2348 = vmatprep.subr.msk.mxu0 %vm395_vm2, %v369_v2  ;;  %v674_v34 = vmul.f32 %v2771_v30, %v661_v31  ;;  %v673_v42 = vmul.f32 %v2783_v38, %v664_v39  ;;  %v1083_v2 = vsub.s32 7, %v2725_v6 }
  0x99   : > { %2349 = vmatpush1.msk.msra.mxu0 %vm395_vm2, %v2694_v1  ;;  %544 = vmatprep.mubr.f32.mxu0 %v2573_v0 }
  0x9a   : > { %2352 = vmatprep.subr.msk.mxu0 %vm395_vm2, %v570_v24  ;;  %v763_v36 = vpop.permute.xlu1 %762  ;;  %v760_v37 = vpop.permute.xlu0 %759  ;;  %v2843_v10 = vrot.slane %v2736_v9, %v1083_v2  ;;  %v2854_v9 = vrot.slane %v2731_v8, %v1083_v2  ;;  %v2367_v8 = vld [vmem:[%s3051_s2 + $0x30] sm:$0xff] }
  0x9b   : > { %v765_v41 = vsel %vm764_vm5, %v763_v36, %v760_v37  ;;  %v768_v49 = vsel %vm764_vm5, %v760_v37, %v763_v36  ;;  %v2876_v24 = vld [vmem:[%s3050_s1 + $0x10] ss:$0 sm:$0xff]  ;;  %v364_v37 = vld [vmem:[%s3053_s4] sm:$0xff] }
  0x9c   : > { %v778_v44 = vmul.f32 %v2789_v40, %v765_v41  ;;  %v777_v52 = vmul.f32 %v2801_v48, %v768_v49 }
  0x9e   : > { %v866_v46 = vpop.permute.xlu1 %865  ;;  %v864_v47 = vpop.permute.xlu0 %863 }
  0x9f   : > { %v872_v51 = vsel %vm867_vm6, %v866_v46, %v864_v47  ;;  %v868_v59 = vsel %vm867_vm6, %v864_v47, %v866_v46  ;;  %v365_v47 = vld [vmem:[%s3054_s5] sm:$0xff] }
  0xa0   : > { %2350 = vmatmul.mubr.msk.f32.vlgmr.msra.gmra.mrb[0].mxu0 %vm391_vm3, %v2344_v33  ;;  %v882_v54 = vmul.f32 %v2807_v50, %v872_v51  ;;  %v881_v62 = vmul.f32 %v2819_v58, %v868_v59 }
  0xa1   : > { %2353 = vmatpush1.msk.msra.mxu0 %vm395_vm2, %v569_v32  ;;  %646 = vmatprep.mubr.f32.mxu0 %v2573_v0 }
  0xa2   : > { %2356 = vmatprep.subr.msk.mxu0 %vm395_vm2, %v674_v34  ;;  %v970_v56 = vpop.permute.xlu1 %969  ;;  %v968_v57 = vpop.permute.xlu0 %967 }
  0xa3   : > { %v976_v61 = vsel %vm971_vm7, %v970_v56, %v968_v57  ;;  %v972_v7 = vsel %vm971_vm7, %v968_v57, %v970_v56 }
  0xa4   : > { %v986_v1 = vmul.f32 %v2825_v60, %v976_v61  ;;  %v985_v11 = vmul.f32 %v2837_v5, %v972_v7 }
  0xa6   : > { %v1074_v3 = vpop.permute.xlu1 %1073  ;;  %v1072_v4 = vpop.permute.xlu0 %1071 }
  0xa7   : > { %v1080_v6 = vsel %vm1075_vm8, %v1074_v3, %v1072_v4  ;;  %v1076_v19 = vsel %vm1075_vm8, %v1072_v4, %v1074_v3 }
  0xa8   : > { %2354 = vmatmul.mubr.msk.f32.vlgmr.msra.gmra.mrb[0].mxu0 %vm391_vm3, %v2351_v43  ;;  %v1090_v15 = vmul.f32 %v2843_v10, %v1080_v6  ;;  %v1089_v22 = vmul.f32 %v2854_v9, %v1076_v19 }
  0xa9   : > { %2357 = vmatpush1.msk.msra.mxu0 %vm395_vm2, %v673_v42  ;;  %750 = vmatprep.mubr.f32.mxu0 %v2573_v0 }
  0xaa   : > { %2360 = vmatprep.subr.msk.mxu0 %vm395_vm2, %v778_v44  ;;  %v1178_v17 = vpop.permute.xlu1 %1177  ;;  %v1176_v18 = vpop.permute.xlu0 %1175 }
  0xab   : > { %v1184_v21 = vsel %vm1179_vm9, %v1178_v17, %v1176_v18  ;;  %v1180_v25 = vsel %vm1179_vm9, %v1176_v18, %v1178_v17 }
  0xac   : > { %v1194_v23 = vmul.f32 %v2862_v20, %v1184_v21  ;;  %v1193_v26 = vmul.f32 %v2876_v24, %v1180_v25 }
  0xb0   : > { %2358 = vmatmul.mubr.msk.f32.vlgmr.msra.gmra.mrb[0].mxu0 %vm391_vm3, %v2355_v53 }
  0xb1   : > { %2361 = vmatpush1.msk.msra.mxu0 %vm395_vm2, %v777_v52  ;;  %854 = vmatprep.mubr.f32.mxu0 %v2573_v0 }
  0xb2   : > { %2364 = vmatprep.subr.msk.mxu0 %vm395_vm2, %v882_v54 }
  0xb8   : > { %2362 = vmatmul.mubr.msk.f32.vlgmr.msra.gmra.mrb[0].mxu0 %vm391_vm3, %v2359_v63 }
  0xb9   : > { %2365 = vmatpush1.msk.msra.mxu0 %vm395_vm2, %v881_v62  ;;  %958 = vmatprep.mubr.f32.mxu0 %v2573_v0 }
  0xba   : > { %2368 = vmatprep.subr.msk.mxu0 %vm395_vm2, %v986_v1 }
  0xbb   : > { %v1282_v31 = vpop.permute.xlu0 %1281 }
  0xc0   : > { %2366 = vmatmul.mubr.msk.f32.vlgmr.msra.gmra.mrb[0].mxu0 %vm391_vm3, %v2363_v12 }
  0xc1   : > { %2369 = vmatpush1.msk.msra.mxu0 %vm395_vm2, %v985_v11  ;;  %1062 = vmatprep.mubr.f32.mxu0 %v2573_v0 }
  0xc2   : > { %2372 = vmatprep.subr.msk.mxu0 %vm395_vm2, %v1090_v15 }
  0xc8   : > { %2370 = vmatmul.mubr.msk.f32.vlgmr.msra.gmra.mrb[0].mxu0 %vm391_vm3, %v2367_v8 }
  0xc9   : > { %2373 = vmatpush1.msk.msra.mxu0 %vm395_vm2, %v1089_v22  ;;  %1166 = vmatprep.mubr.f32.mxu0 %v2573_v0 }
  0xca   : > { %2378 = vmatprep.subr.msk.mxu0 %vm395_vm2, %v1194_v23 }
  0xd0   : > { %2374 = vmatmul.mubr.msk.f32.vlgmr.msra.gmra.mrb[0].mxu0 %vm391_vm3, %v2371_v27 }
  0xd1   : > { %2379 = vmatpush1.msk.msra.mxu0 %vm395_vm2, %v1193_v26  ;;  %1270 = vmatprep.mubr.f32.mxu0 %v2573_v0 }
  0xd8   : > { %2380 = vmatmul.mubr.msk.f32.vlgmr.msra.gmra.mrb[0].mxu0 %vm391_vm3, %v2377_v29 }
 0x1ab   : > { %v1272_v32 = vpop.f32.mrb[0].mxu0 }
 0x1ac   : > { %v1284_v33 = vadd.f32 %v1282_v31, %v1272_v32  ;;  %v1274_v34 = vpop.f32.mrb[1].mxu0 }
 0x1ad   : > { %v1285_v35 = vadd.f32 %v1282_v31, %v1274_v34 }
 0x1af   : > { %v1286_v36 = vadd.f32 %v1285_v35, %v1284_v33 }
 0x1b1   : > { %1287 = vadd.xlane.f32.xlu1 %v1286_v36 }
 0x1c2   : > { %1305 = vperm.xlu1 %2487, %v364_v37  }
 0x23e   : > { %v1288_v39 = vpop.xlane.xlu1 %1287 }
 0x23f   : > { %v1290_v41 = vmul.f32 0.00390625, %v1288_v39 }
 0x241   : > { %v1291_v42 = vsub.f32 %v1284_v33, %v1290_v41  ;;  %v1292_v43 = vsub.f32 %v1285_v35, %v1290_v41 }
 0x242   : > { %v1306_v54 = vpop.permute.xlu1 %1305 }
 0x243   : > { %v1293_v44 = vmul.f32 %v1291_v42, %v1291_v42  ;;  %v1294_v45 = vmul.f32 %v1292_v43, %v1292_v43 }
 0x245   : > { %v1295_v46 = vadd.f32 %v1294_v45, %v1293_v44 }
 0x247   : > { %1296 = vadd.xlane.f32.xlu0 %v1295_v46 }
 0x25d   : > { %1312 = vperm.xlu0 %2486, %v365_v47  }
 0x2d4   : > { %v1297_v49 = vpop.xlane.xlu0 %1296 }
 0x2d5   : > { %v1298_v51 = vmul.f32 0.00390625, %v1297_v49 }
 0x2d7   : > { %v1299_v52 = vadd.f32 1e-05, %v1298_v51 }
 0x2d9   : > { %2489 = vrsqrt.f32 %v1299_v52 }
 0x2dc   : > { %v1313_v61 = vpop.permute.xlu0 %1312 }
 0x2e3   : > { %v2490_v53 = vpop.eup %2489 }
 0x2e4   : > { %v1301_v55 = vmul.f32 %v2490_v53, %v1291_v42  ;;  %v1302_v56 = vmul.f32 %v2490_v53, %v1292_v43 }
 0x2e6   : > { %v1308_v57 = vmul.f32 %v1306_v54, %v1301_v55  ;;  %v1309_v59 = vmul.f32 %v1306_v54, %v1302_v56 }
 0x2e8   : > { %v1315_v62 = vadd.f32 %v1313_v61, %v1308_v57  ;;  %v1316_v63 = vadd.f32 %v1313_v61, %v1309_v59 }
 0x2ea   : > { %v1317_v1 = vmul.f32 0.70710677, %v1315_v62  ;;  %v1318_v2 = vmul.f32 0.70710677, %v1316_v63 }
 0x2ec   : > { %v1319_v3 = vand.u32 2147483647, %v1317_v1  ;;  %v1320_v4 = vand.u32 2147483647, %v1318_v2  ;;  %vm1363_vm10 = vcmp.ge.f32.partialorder %v1317_v1, 0.0  ;;  %vm1364_vm11 = vcmp.ge.f32.partialorder %v1318_v2, 0.0 }
 0x2ee   : > { %v1321_v7 = vmul.f32 0.3275911, %v1319_v3  ;;  %v1322_v6 = vmul.f32 0.3275911, %v1320_v4  ;;  %v1351_v21 = vsub.f32 0.0, %v1319_v3  ;;  %v1352_v8 = vsub.f32 0.0, %v1320_v4 }
 0x2f0   : > { %v1323_v11 = vadd.f32 1.0, %v1321_v7  ;;  %v1324_v12 = vadd.f32 1.0, %v1322_v6  ;;  %v1353_v27 = vmul.f32 %v1351_v21, %v1319_v3  ;;  %v1354_v31 = vmul.f32 %v1352_v8, %v1320_v4 }
 0x2f2   : > { %2491 = vrcp.f32 %v1323_v11  ;;  %v1355_v35 = vmul.f32 1.442695, %v1353_v27  ;;  %v1357_v37 = vmul.f32 1.442695, %v1354_v31 }
 0x2f3   : > { %2493 = vrcp.f32 %v1324_v12 }
 0x2f4   : > { %2495 = vpow2.f32 %v1355_v35 }
 0x2f5   : > { %2497 = vpow2.f32 %v1357_v37 }
 0x2fc   : > { %v2492_v15 = vpop.eup %2491 }
 0x2fd   : > { %v2494_v17 = vpop.eup %2493  ;;  %v1327_v18 = vmul.f32 %v2492_v15, %v1323_v11 }
 0x2fe   : > { %v1328_v19 = vmul.f32 %v2494_v17, %v1324_v12  ;;  %v2496_v54 = vpop.eup %2495  ;;  %v1370_v12 = vmul.f32 0.5, %v1316_v63 }
 0x2ff   : > { %v1329_v22 = vsub.f32 2.0, %v1327_v18  ;;  %v2498_v56 = vpop.eup %2497 }
 0x300   : > { %v1330_v23 = vsub.f32 2.0, %v1328_v19  ;;  %v1369_v19 = vmul.f32 0.5, %v1315_v62  ;;  %v1375_v62 = vld [vmem:[%s3056_s7] sm:$0xff] }
 0x301   : > { %v1331_v25 = vmul.f32 %v2492_v15, %v1329_v22 }
 0x302   : > { %v1332_v26 = vmul.f32 %v2494_v17, %v1330_v23 }
 0x303   : > { %v1333_v29 = vmul.f32 1.0614054, %v1331_v25 }
 0x304   : > { %v1334_v32 = vmul.f32 1.0614054, %v1332_v26 }
 0x305   : > { %v1335_v33 = vadd.f32 -1.4531521, %v1333_v29 }
 0x306   : > { %v1336_v34 = vadd.f32 -1.4531521, %v1334_v32 }
 0x307   : > { %v1337_v36 = vmul.f32 %v1335_v33, %v1331_v25 }
 0x308   : > { %v1338_v39 = vmul.f32 %v1336_v34, %v1332_v26  ;;  %v2381_v34 = vld [vmem:[%s3055_s6 + $0x20] sm:$0xff] }
 0x309   : > { %v1339_v41 = vadd.f32 1.4214138, %v1337_v36 }
 0x30a   : > { %v1340_v42 = vadd.f32 1.4214138, %v1338_v39 }
 0x30b   : > { %v1341_v43 = vmul.f32 %v1339_v41, %v1331_v25 }
 0x30c   : > { %v1342_v44 = vmul.f32 %v1340_v42, %v1332_v26  ;;  %v2384_v42 = vld [vmem:[%s3055_s6 + $0x8] sm:$0xff] }
 0x30d   : > { %v1343_v45 = vadd.f32 -0.28449672, %v1341_v43 }
 0x30e   : > { %v1344_v46 = vadd.f32 -0.28449672, %v1342_v44 }
 0x30f   : > { %v1345_v47 = vmul.f32 %v1343_v45, %v1331_v25 }
 0x310   : > { %v1346_v49 = vmul.f32 %v1344_v46, %v1332_v26 }
 0x311   : > { %v1347_v51 = vadd.f32 0.2548296, %v1345_v47  ;;  %v2386_v47 = vld [vmem:[%s3055_s6 + $0x10] sm:$0xff] }
 0x312   : > { %v1348_v52 = vadd.f32 0.2548296, %v1346_v49 }
 0x313   : > { %v1349_v53 = vmul.f32 %v1347_v51, %v1331_v25  ;;  %v1393_v25 = vld [vmem:[%s3055_s6] sm:$0xff] }
 0x314   : > { %v1350_v55 = vmul.f32 %v1348_v52, %v1332_v26 }
 0x315   : > { %v1359_v57 = vmul.f32 %v2496_v54, %v1349_v53  ;;  %v2388_v54 = vld [vmem:[%s3055_s6 + $0x18] sm:$0xff] }
 0x316   : > { %v1360_v59 = vmul.f32 %v2498_v56, %v1350_v55 }
 0x317   : > { %v1361_v61 = vsub.f32 1.0, %v1359_v57 }
 0x318   : > { %v1362_v3 = vsub.f32 1.0, %v1360_v59 }
 0x319   : > { %v1365_v4 = vsub.f32 0.0, %v1361_v61 }
 0x31a   : > { %v1366_v7 = vsub.f32 0.0, %v1362_v3 }
 0x31b   : > { %v1367_v6 = vsel %vm1363_vm10, %v1361_v61, %v1365_v4  ;;  %v2390_v61 = vld [vmem:[%s3055_s6 + $0x28] sm:$0xff] }
 0x31c   : > { %v1368_v11 = vsel %vm1364_vm11, %v1362_v3, %v1366_v7  ;;  %v1371_v17 = vadd.f32 1.0, %v1367_v6 }
 0x31d   : > { %v1372_v15 = vadd.f32 1.0, %v1368_v11  ;;  %v2392_v11 = vld [vmem:[%s3055_s6 + $0x30] sm:$0xff] }
 0x31e   : > { %v1373_v21 = vmul.f32 %v1371_v17, %v1369_v19 }
 0x31f   : > { %v1374_v18 = vmul.f32 %v1372_v15, %v1370_v12  ;;  %v2394_v15 = vld [vmem:[%s3055_s6 + $0x38] sm:$0xff] }
 0x321   : > { %1543 = vrot.lane.b32.xlu0 %v1374_v18, %s2575_s11  ;;  %1381 = vrot.lane.b32.xlu1 %v1374_v18, %s2574_s30 }
 0x325   : > { %1632 = vrot.lane.b32.xlu0 %v1374_v18, %s2576_s12  ;;  %1385 = vrot.lane.b32.xlu1 %v1373_v21, %s2574_s30  ;;  %s2583_s30 = smov [#allocation2]  }
 0x326   : > { %s2513_s29 = sshll.u32 %s2583_s30, 4  ;;  %s2514_s29 = int_to_ptr.vmem [resolvable:$false] %s2513_s29 }
 0x329   : > { %1721 = vrot.lane.b32.xlu0 %v1374_v18, %s2577_s18  ;;  %1546 = vrot.lane.b32.xlu1 %v1373_v21, %s2575_s11  ;;  %s350_s11 = sand.u32 1, %s2563_s14  }
 0x32d   : > { %1810 = vrot.lane.b32.xlu0 %v1373_v21, %s2578_s20  ;;  %1635 = vrot.lane.b32.xlu1 %v1373_v21, %s2576_s12  ;;  %s2341_s12 = sshll.u32 %s350_s11, 4 }
 0x331   : > { %1899 = vrot.lane.b32.xlu0 %v1373_v21, %s3068_s26  ;;  %1724 = vrot.lane.b32.xlu1 %v1373_v21, %s2577_s18  ;;  %s2404_s18 = sshll.u32 %s2660_s17, 8  ;;  %s2264_s17 = scalar_lea.sflag [#allocation3], %s350_s11 }
 0x335   : > { %1988 = vrot.lane.b32.xlu0 %v1373_v21, %s3069_s27  ;;  %1812 = vrot.lane.b32.xlu1 %v1374_v18, %s2578_s20  ;;  %s352_s20 = scalar_lea.vmem [#allocation2], %s2341_s12  ;;  %s2515_s12 = scalar_lea.vmem %s2514_s29, 512 }
 0x336   : > { %s2278_s21 = sshll.u32 %s352_s20, 4  ;;  %s3009_s21 = int_to_ptr.vmem [resolvable:$true] %s2278_s21 }
 0x337   : > { %p2516_p0 = scmp.lt.s32.totalorder %s3009_s21, %s2514_s29 }
 0x339   : > { %2077 = vrot.lane.b32.xlu0 %v1373_v21, %s3070_s28  ;;  %1901 = vrot.lane.b32.xlu1 %v1374_v18, %s3068_s26 }
 0x33d   : > { %2168 = vperm.xlu0 %2486, %v1375_v62   ;;  %1990 = vrot.lane.b32.xlu1 %v1374_v18, %s3069_s27  ;;  %s3007_s27 = scalar_lea.hbm %s3059_s10, %s2404_s18 }
 0x341   : > { %2079 = vrot.lane.b32.xlu1 %v1374_v18, %s3070_s28  ;;  %s2509_s28 = scalar_lea.vmem %s3009_s21, 256 }
 0x342   : > { %p2510_p11 = scmp.ne.s32.totalorder %s3009_s21, %s2509_s28  ;;  %p2517_p1 = scmp.lt.s32.totalorder %s2515_s12, %s2509_s28 }
 0x344   : > { %p2511_p12 = pnand %p2510_p11, %p2677_p5  ;;  %p2518_p2 = por %p2517_p1, %p2516_p0 }
 0x346   : > { %p2512_p13 = pneg %p2511_p12 }
 0x348   : > { %p2519_p3 = pnand %p2518_p2, %p2512_p13 }
 0x393   : > { %v1382_v63 = vpop.permute.xlu1 %1381  ;;  %v1544_v26 = vpop.permute.xlu0 %1543 }
 0x397   : > { %v1386_v1 = vpop.permute.xlu1 %1385 }
 0x398   : > { %v1390_v2 = vsel %vm375_vm0, %v1382_v63, %v1386_v1  ;;  %v1387_v22 = vsel %vm375_vm0, %v1386_v1, %v1382_v63 }
 0x399   : > { %v1392_v8 = vmul.f32 %v1387_v22, %v2743_v14  ;;  %v1391_v23 = vmul.f32 %v1390_v2, %v2740_v13  ;;  %v1633_v14 = vpop.permute.xlu0 %1632 }
 0x39b   : > { %1398 = vmatprep.subr.mxu1 %v1392_v8  ;;  %v1547_v27 = vpop.permute.xlu1 %1546 }
 0x39c   : > { %v1548_v29 = vsel %vm556_vm1, %v1547_v27, %v1544_v26  ;;  %1399 = vmatpush1.msra.mxu1 %v1391_v23  ;;  %v1551_v32 = vsel %vm556_vm1, %v1544_v26, %v1547_v27  ;;  %v1376_v26 = vld [vmem:[%s3057_s8] sm:$0xff] }
 0x39d   : > { %v1553_v31 = vmul.f32 %v1548_v29, %v2746_v16  ;;  %2382 = vmatmul.mubr.msk.f32.vlgmr.msra.gmra.mrb[0].mxu1 %vm1394_vm12, %v1393_v25  ;;  %1472 = vmatprep.subr.mxu1 %v1374_v18  ;;  %v1552_v35 = vmul.f32 %v1551_v32, %v2763_v28  ;;  %v1722_v37 = vpop.permute.xlu0 %1721 }
 0x39e   : > { %1473 = vmatpush1.msra.mxu1 %v1373_v21  ;;  %1536 = vmatprep.mubr.f32.mxu1 %v2573_v0 }
 0x39f   : > { %1559 = vmatprep.subr.mxu1 %v1553_v31  ;;  %v1636_v13 = vpop.permute.xlu1 %1635 }
 0x3a0   : > { %v1637_v33 = vsel %vm660_vm4, %v1636_v13, %v1633_v14  ;;  %v1640_v39 = vsel %vm660_vm4, %v1633_v14, %v1636_v13 }
 0x3a1   : > { %v1642_v16 = vmul.f32 %v1637_v33, %v2771_v30  ;;  %v1641_v28 = vmul.f32 %v1640_v39, %v2783_v38  ;;  %v1811_v44 = vpop.permute.xlu0 %1810 }
 0x3a3   : > { %v1725_v36 = vpop.permute.xlu1 %1724 }
 0x3a4   : > { %v1726_v41 = vsel %vm764_vm5, %v1725_v36, %v1722_v37  ;;  %v1729_v45 = vsel %vm764_vm5, %v1722_v37, %v1725_v36 }
 0x3a5   : > { %2383 = vmatmul.mubr.msk.f32.vlgmr.msra.gmra.mrb[0].mxu1 %vm1394_vm12, %v2381_v34  ;;  %v1731_v30 = vmul.f32 %v1726_v41, %v2789_v40  ;;  %v1730_v38 = vmul.f32 %v1729_v45, %v2801_v48  ;;  %v1900_v51 = vpop.permute.xlu0 %1899 }
 0x3a6   : > { %1560 = vmatpush1.msra.mxu1 %v1552_v35  ;;  %1623 = vmatprep.mubr.f32.mxu1 %v2573_v0 }
 0x3a7   : > { %1648 = vmatprep.subr.mxu1 %v1642_v16  ;;  %v1813_v43 = vpop.permute.xlu1 %1812 }
 0x3a8   : > { %v1818_v46 = vsel %vm867_vm6, %v1813_v43, %v1811_v44  ;;  %v1814_v52 = vsel %vm867_vm6, %v1811_v44, %v1813_v43 }
 0x3a9   : > { %v1820_v40 = vmul.f32 %v1818_v46, %v2807_v50  ;;  %v1819_v48 = vmul.f32 %v1814_v52, %v2819_v58  ;;  %v1989_v56 = vpop.permute.xlu0 %1988 }
 0x3ab   : > { %v1902_v49 = vpop.permute.xlu1 %1901 }
 0x3ac   : > { %v1907_v53 = vsel %vm971_vm7, %v1902_v49, %v1900_v51  ;;  %v1903_v57 = vsel %vm971_vm7, %v1900_v51, %v1902_v49 }
 0x3ad   : > { %2385 = vmatmul.mubr.msk.f32.vlgmr.msra.gmra.mrb[0].mxu1 %vm1394_vm12, %v2384_v42  ;;  %v1909_v50 = vmul.f32 %v1907_v53, %v2825_v60  ;;  %v1908_v58 = vmul.f32 %v1903_v57, %v2837_v5  ;;  %v2078_v4 = vpop.permute.xlu0 %2077 }
 0x3ae   : > { %1649 = vmatpush1.msra.mxu1 %v1641_v28  ;;  %1712 = vmatprep.mubr.f32.mxu1 %v2573_v0 }
 0x3af   : > { %1737 = vmatprep.subr.mxu1 %v1731_v30  ;;  %v1991_v55 = vpop.permute.xlu1 %1990 }
 0x3b0   : > { %v1996_v59 = vsel %vm1075_vm8, %v1991_v55, %v1989_v56  ;;  %v1992_v7 = vsel %vm1075_vm8, %v1989_v56, %v1991_v55 }
 0x3b1   : > { %v1998_v60 = vmul.f32 %v1996_v59, %v2843_v10  ;;  %v1997_v5 = vmul.f32 %v1992_v7, %v2854_v9  ;;  %v2396_v9 = vld [vmem:[%s3055_s6 + $0x40] sm:$0xff] }
 0x3b3   : > { %v2080_v3 = vpop.permute.xlu1 %2079 }
 0x3b4   : > { %v2085_v6 = vsel %vm1179_vm9, %v2080_v3, %v2078_v4  ;;  %v2081_v12 = vsel %vm1179_vm9, %v2078_v4, %v2080_v3 }
 0x3b5   : > { %2387 = vmatmul.mubr.msk.f32.vlgmr.msra.gmra.mrb[0].mxu1 %vm1394_vm12, %v2386_v47  ;;  %v2087_v10 = vmul.f32 %v2862_v20, %v2085_v6  ;;  %v2086_v17 = vmul.f32 %v2876_v24, %v2081_v12  ;;  %v1377_v24 = vld [vmem:[%s3058_s9] sm:$0xff] }
 0x3b6   : > { %1738 = vmatpush1.msra.mxu1 %v1730_v38  ;;  %1801 = vmatprep.mubr.f32.mxu1 %v2573_v0 }
 0x3b7   : > { %1826 = vmatprep.subr.mxu1 %v1820_v40 }
 0x3bc   : > { %v2169_v20 = vpop.permute.xlu0 %2168 }
 0x3bd   : > { %2389 = vmatmul.mubr.msk.f32.vlgmr.msra.gmra.mrb[0].mxu1 %vm1394_vm12, %v2388_v54 }
 0x3be   : > { %1827 = vmatpush1.msra.mxu1 %v1819_v48  ;;  %1890 = vmatprep.mubr.f32.mxu1 %v2573_v0 }
 0x3bf   : > { %1915 = vmatprep.subr.mxu1 %v1909_v50 }
 0x3c5   : > { %2391 = vmatmul.mubr.msk.f32.vlgmr.msra.gmra.mrb[0].mxu1 %vm1394_vm12, %v2390_v61 }
 0x3c6   : > { %1916 = vmatpush1.msra.mxu1 %v1908_v58  ;;  %1979 = vmatprep.mubr.f32.mxu1 %v2573_v0 }
 0x3c7   : > { %2004 = vmatprep.subr.mxu1 %v1998_v60 }
 0x3cd   : > { %2393 = vmatmul.mubr.msk.f32.vlgmr.msra.gmra.mrb[0].mxu1 %vm1394_vm12, %v2392_v11 }
 0x3ce   : > { %2005 = vmatpush1.msra.mxu1 %v1997_v5  ;;  %2068 = vmatprep.mubr.f32.mxu1 %v2573_v0 }
 0x3cf   : > { %2093 = vmatprep.subr.mxu1 %v2087_v10 }
 0x3d5   : > { %2395 = vmatmul.mubr.msk.f32.vlgmr.msra.gmra.mrb[0].mxu1 %vm1394_vm12, %v2394_v15 }
 0x3d6   : > { %2094 = vmatpush1.msra.mxu1 %v2086_v17  ;;  %2157 = vmatprep.mubr.f32.mxu1 %v2573_v0 }
 0x3dd   : > { %2397 = vmatmul.mubr.msk.f32.vlgmr.msra.gmra.mrb[0].mxu1 %vm1394_vm12, %v2396_v9 }
 0x4b0   : > { %v2159_v18 = vpop.f32.mrb[0].mxu1 }
 0x4b1   : > { %v2171_v19 = vadd.f32 %v2169_v20, %v2159_v18  ;;  %v2161_v21 = vpop.f32.mrb[1].mxu1 }
 0x4b2   : > { %v2172_v62 = vadd.f32 %v2169_v20, %v2161_v21 }
 0x4b4   : > { %v2173_v63 = vadd.f32 %v2172_v62, %v2171_v19 }
 0x4b6   : > { %2174 = vadd.xlane.f32.xlu1 %v2173_v63 }
 0x4c7   : > { %2198 = vperm.xlu1 %2487, %v1377_v24  }
 0x543   : > { %v2175_v1 = vpop.xlane.xlu1 %2174 }
 0x544   : > { %v2176_v0 = vmul.f32 0.00390625, %v2175_v1 }
 0x546   : > { %v2177_v2 = vsub.f32 %v2171_v19, %v2176_v0  ;;  %v2178_v22 = vsub.f32 %v2172_v62, %v2176_v0 }
 0x547   : > { %v2199_v16 = vpop.permute.xlu1 %2198 }
 0x548   : > { %v2179_v8 = vmul.f32 %v2177_v2, %v2177_v2  ;;  %v2180_v23 = vmul.f32 %v2178_v22, %v2178_v22 }
 0x54a   : > { %v2181_v25 = vadd.f32 %v2180_v23, %v2179_v8 }
 0x54c   : > { %2182 = vadd.xlane.f32.xlu0 %v2181_v25 }
 0x562   : > { %2191 = vperm.xlu0 %2486, %v1376_v26  }
 0x5d9   : > { %v2183_v27 = vpop.xlane.xlu0 %2182 }
 0x5da   : > { %v2184_v29 = vmul.f32 0.00390625, %v2183_v27 }
 0x5dc   : > { %v2185_v31 = vadd.f32 1e-05, %v2184_v29 }
 0x5de   : > { %2499 = vrsqrt.f32 %v2185_v31 }
 0x5e1   : > { %v2192_v33 = vpop.permute.xlu0 %2191 }
 0x5e8   : > { %v2500_v13 = vpop.eup %2499 }
 0x5e9   : > { %v2187_v14 = vmul.f32 %v2500_v13, %v2177_v2  ;;  %v2188_v32 = vmul.f32 %v2500_v13, %v2178_v22 }
 0x5eb   : > { %v2194_v34 = vmul.f32 %v2192_v33, %v2187_v14  ;;  %v2195_v35 = vmul.f32 %v2192_v33, %v2188_v32 }
 0x5ed   : > { %v2201_v36 = vadd.f32 %v2199_v16, %v2194_v34  ;;  %v2998_v37 = vadd.f32 %v2199_v16, %v2195_v35 }
 0x5ef   : > { %v2203_v39 = vmul.f32 0.70710677, %v2201_v36  ;;  %v2204_v41 = vmul.f32 0.70710677, %v2998_v37  ;;  %v2255_v25 = vmul.f32 0.5, %v2201_v36  ;;  %v2256_v27 = vmul.f32 0.5, %v2998_v37 }
 0x5f1   : > { %v2205_v42 = vand.u32 2147483647, %v2203_v39  ;;  %v2206_v28 = vand.u32 2147483647, %v2204_v41  ;;  %vm2249_vm13 = vcmp.ge.f32.partialorder %v2203_v39, 0.0  ;;  %vm2250_vm14 = vcmp.ge.f32.partialorder %v2204_v41, 0.0 }
 0x5f3   : > { %v2207_v30 = vmul.f32 0.3275911, %v2205_v42  ;;  %v2208_v43 = vmul.f32 0.3275911, %v2206_v28  ;;  %v2237_v49 = vsub.f32 0.0, %v2205_v42  ;;  %v2238_v52 = vsub.f32 0.0, %v2206_v28 }
 0x5f5   : > { %v2209_v44 = vadd.f32 1.0, %v2207_v30  ;;  %v2210_v45 = vadd.f32 1.0, %v2208_v43  ;;  %v2239_v50 = vmul.f32 %v2237_v49, %v2205_v42  ;;  %v2240_v56 = vmul.f32 %v2238_v52, %v2206_v28 }
 0x5f7   : > { %2501 = vrcp.f32 %v2209_v44  ;;  %v2241_v58 = vmul.f32 1.442695, %v2239_v50  ;;  %v2243_v3 = vmul.f32 1.442695, %v2240_v56 }
 0x5f8   : > { %2503 = vrcp.f32 %v2210_v45 }
 0x5f9   : > { %2505 = vpow2.f32 %v2241_v58 }
 0x5fa   : > { %2507 = vpow2.f32 %v2243_v3 }
 0x601   : > { %v2502_v46 = vpop.eup %2501 }
 0x602   : > { %v2504_v47 = vpop.eup %2503  ;;  %v2213_v38 = vmul.f32 %v2502_v46, %v2209_v44 }
 0x603   : > { %v2214_v40 = vmul.f32 %v2504_v47, %v2210_v45  ;;  %v2506_v19 = vpop.eup %2505 }
 0x604   : > { %v2215_v51 = vsub.f32 2.0, %v2213_v38  ;;  %v2508_v62 = vpop.eup %2507 }
 0x605   : > { %v2216_v53 = vsub.f32 2.0, %v2214_v40 }
 0x606   : > { %v2217_v54 = vmul.f32 %v2502_v46, %v2215_v51 }
 0x607   : > { %v2218_v48 = vmul.f32 %v2504_v47, %v2216_v53 }
 0x608   : > { %v2219_v55 = vmul.f32 1.0614054, %v2217_v54 }
 0x609   : > { %v2220_v57 = vmul.f32 1.0614054, %v2218_v48 }
 0x60a   : > { %v2221_v59 = vadd.f32 -1.4531521, %v2219_v55 }
 0x60b   : > { %v2222_v61 = vadd.f32 -1.4531521, %v2220_v57 }
 0x60c   : > { %v2223_v60 = vmul.f32 %v2221_v59, %v2217_v54 }
 0x60d   : > { %v2224_v4 = vmul.f32 %v2222_v61, %v2218_v48 }
 0x60e   : > { %v2225_v7 = vadd.f32 1.4214138, %v2223_v60 }
 0x60f   : > { %v2226_v6 = vadd.f32 1.4214138, %v2224_v4 }
 0x610   : > { %v2227_v11 = vmul.f32 %v2225_v7, %v2217_v54 }
 0x611   : > { %v2228_v5 = vmul.f32 %v2226_v6, %v2218_v48 }
 0x612   : > { %v2229_v10 = vadd.f32 -0.28449672, %v2227_v11 }
 0x613   : > { %v2230_v12 = vadd.f32 -0.28449672, %v2228_v5 }
 0x614   : > { %v2231_v15 = vmul.f32 %v2229_v10, %v2217_v54 }
 0x615   : > { %v2232_v17 = vmul.f32 %v2230_v12, %v2218_v48 }
 0x616   : > { %v2233_v9 = vadd.f32 0.2548296, %v2231_v15 }
 0x617   : > { %v2234_v20 = vadd.f32 0.2548296, %v2232_v17 }
 0x618   : > { %v2235_v18 = vmul.f32 %v2233_v9, %v2217_v54 }
 0x619   : > { %v2236_v21 = vmul.f32 %v2234_v20, %v2218_v48 }
 0x61a   : > { %v2245_v63 = vmul.f32 %v2506_v19, %v2235_v18 }
 0x61b   : > { %v2246_v24 = vmul.f32 %v2508_v62, %v2236_v21 }
 0x61c   : > { %v2247_v1 = vsub.f32 1.0, %v2245_v63 }
 0x61d   : > { %v2248_v0 = vsub.f32 1.0, %v2246_v24 }
 0x61e   : > { %v2251_v2 = vsub.f32 0.0, %v2247_v1 }
 0x61f   : > { %v2252_v22 = vsub.f32 0.0, %v2248_v0 }
 0x620   : > { %v2253_v8 = vsel %vm2249_vm13, %v2247_v1, %v2251_v2 }
 0x621   : > { %v2254_v23 = vsel %vm2250_vm14, %v2248_v0, %v2252_v22  ;;  %v2257_v26 = vadd.f32 1.0, %v2253_v8 }
 0x622   : > { %v2258_v29 = vadd.f32 1.0, %v2254_v23 }
 0x623   : > { %v2259_v31 = vmul.f32 %v2257_v26, %v2255_v25 }
 0x624   : > { %v2260_v13 = vmul.f32 %v2258_v29, %v2256_v27 }
 0x625   : > { %2261 = vst [vmem:[%s352_s20] sm:$0xff] %v2259_v31 }
 0x626   : > { %2262 = vst [vmem:[%s352_s20 + $0x8] sm:$0xff] %v2260_v13 }
 0x627   : > { %2522 = shalt.err (!%p2519_p3)
}
 0x628   : > { %s2523_s11 = scalar_lea.hbm %s3007_s27, 256  ;;  %s2527_s25 = scalar_lea.hbm %s3059_s10, 512 }
 0x629   : > { %p2524_p4 = scmp.ne.s32.totalorder %s3007_s27, %s2523_s11  ;;  %p2528_p9 = scmp.lt.u32.totalorder %s3007_s27, %s3059_s10 }
 0x62a   : > { %p2529_p10 = scmp.lt.u32.totalorder %s2527_s25, %s2523_s11  ;;  %p2531_p12 = scmp.lt.u32.totalorder %s2523_s11, %s3007_s27 }
 0x62b   : > { %p2525_p7 = pnand %p2524_p4, %p2677_p5 }
 0x62c   : > { %p2530_p11 = por %p2529_p10, %p2528_p9 }
 0x62d   : > { %p2526_p8 = pneg %p2525_p7 }
 0x62e   : > { %p2532_p13 = por %p2531_p12, %p2530_p11 }
 0x630   : > { %p2533_p0 = pnand %p2532_p13, %p2526_p8 }
 0x632   : > { %2536 = shalt.err (!%p2533_p0)
}
 0x633   : > { %2437 = dma.vmem_to_hbm [thread:$0]  (%p2677_p5), %s3009_s21, 256, %s3007_s27, %s2264_s17  }
 0x634 PF: > { %p2443_p1 = scmp.ge.s32.totalorder %s2571_s16, 2  ;;  %s2290_s28 = sand.u32 1, %s2559_s13  }
 0x635   : > { %s2291_s29 = scalar_lea.sflag [#allocation3], %s2290_s28 }
 0x636   : > { %p2440_p2 = pnand %p2443_p1, %p2681_p6 }
 0x638   : > { %2554 = dma.done.wait (!%p2440_p2), %s2291_s29, 256  }
 0x639   : > { %2556 = vsyncadd (!%p2440_p2), %s2291_s29, 4294967040  ;;  %p20_p3 = scmp.ge.s32.totalorder %s2664_s19, 4   ;;  %s3071_s13 = smov %s2563_s14 }
 0x63a   : > { %s3072_s14 = smov %s2567_s15  ;;  %s3073_s15 = smov %s2675_s22 }
 0x63b   : > { %s3074_s16 = smov %s2664_s19  ;;  %22 = sbr.rel (!%p20_p3) target bundleno = 3 (0x3), region = 111 }
 0x642   :  { %2296 = vsyncpa [#allocation3], 1 }
 0x643   :  { %2298 = vsyncpa [#allocation3 + $0x1], 1 }

</bundles_post_ra>
